<compile_context>
chip_gen: v5e
topology: v5e:2x2
jax: 0.10.0
libtpu: 0.0.40
codegen_flags: <defaults>
</compile_context>

<pallas_src>
import functools
import math

import jax
import jax.numpy as jnp
from jax import lax
from jax.experimental import pallas as pl
from jax.experimental.pallas import tpu as pltpu


def _round_up(x, m):
    return (x + m - 1) // m * m


def _cdiv(a, b):
    return (a + b - 1) // b


def _tpu_memory_budget():
    """Return (per-x-buffer byte target, vmem_limit_bytes), generation dependent."""
    try:
        vmem = int(getattr(pltpu.get_tpu_info(), "vmem_capacity_bytes", 64 << 20))
    except Exception:  # conservative fallback (assume small, v7x-sized VMEM)
        vmem = 64 << 20
    if vmem >= (128 << 20):          # v5e / v6e: 128 MiB VMEM per core
        return 12 << 20, 96 << 20
    return 6 << 20, 48 << 20         # v7x: 64 MiB physical VMEM per core


# ---------------------------------------------------------------------------
# Kernel
# ---------------------------------------------------------------------------
def graphpred_head_kernel(x_ref, w1_ref, b1_ref, w2_ref, b2_ref, w3_ref, b3_ref,
                          out_ref, acc_ref, *, t_total, t_tile):
    """Grid = (B_tiles 'parallel', T_tiles 'arbitrary'); T is the trailing reduction axis.

    x_ref   : (Tt, Bb, D) bf16 encoder-output tile (time-major, no wrapper transpose)
    w1_ref  : (D, 512)  bf16  -- BatchNorm (eval) and the 1/T mean scale folded in
    b1_ref  : (1, 512)  f32   -- BatchNorm folded in
    w2_ref  : (512, 384) bf16 (300 padded to 384 lanes)
    b2_ref  : (1, 384)  f32
    w3_ref  : (384, 128) bf16 (num_tasks padded to 128 lanes -> lane-dense store)
    b3_ref  : (1, 128)  f32
    out_ref : (Bb, 128) f32
    acc_ref : (Bb, D)   f32 scratch -- running sum over T
    """
    t = pl.program_id(1)

    @pl.when(t == 0)
    def _init():
        acc_ref[...] = jnp.zeros_like(acc_ref)

    if t_total % t_tile == 0:
        # All T tiles are full: single vectorized reduce over the leading (time) axis.
        acc_ref[...] += jnp.sum(x_ref[...].astype(jnp.float32), axis=0)
    else:
        rows_left = t_total - t * t_tile   # valid rows in this tile (traced scalar)

        @pl.when(rows_left >= t_tile)
        def _full_tile():
            acc_ref[...] += jnp.sum(x_ref[...].astype(jnp.float32), axis=0)

        @pl.when(rows_left < t_tile)
        def _ragged_tail():
            # Last, partial T tile: only sum the valid rows (OOB rows are undefined).
            @pl.loop(0, rows_left)
            def _row(i):
                acc_ref[...] += x_ref[i].astype(jnp.float32)

    @pl.when(t == pl.num_programs(1) - 1)
    def _finalize():
        # 1/T is folded into w1, so the f32 sum is used directly (bf16 for the MXU).
        emb = acc_ref[...].astype(jnp.bfloat16)                               # (Bb, D)

        # Linear(768->512) with BatchNorm(eval) + 1/T folded in; Dropout = identity; ReLU.
        h1 = jnp.dot(emb, w1_ref[...], preferred_element_type=jnp.float32) + b1_ref[...]
        h1 = jnp.maximum(h1, 0.0).astype(jnp.bfloat16)

        # Linear(512->300 padded 384) + ReLU (Dropout identity).
        h2 = jnp.dot(h1, w2_ref[...], preferred_element_type=jnp.float32) + b2_ref[...]
        h2 = jnp.maximum(h2, 0.0).astype(jnp.bfloat16)

        # Linear(300->num_tasks, padded to 128 lanes) -> lane-dense store.
        out_ref[...] = jnp.dot(h2, w3_ref[...],
                               preferred_element_type=jnp.float32) + b3_ref[...]


# ---------------------------------------------------------------------------
# One-time weight preparation (hoisted out of the per-forward path)
# ---------------------------------------------------------------------------
def prepare_head_params(params, seq_len):
    """Fold BatchNorm1d (eval) + the 1/T mean scale into the first linear, pad the
    hidden/task dims to lane multiples, and cast weights to bf16 for the MXU.
    Call once at init / checkpoint load (re-run only if the sequence length changes)."""
    (w1, b1, gamma, beta, rmean, rvar, w2, b2, w3, b3) = params
    h2 = w2.shape[1]
    num_tasks = w3.shape[1]

    eps = jnp.float32(1e-5)
    scale = gamma * lax.rsqrt(rvar + eps)                              # (1, 512)
    inv_t = jnp.float32(1.0 / seq_len)
    w1f = (w1 * scale * inv_t).astype(jnp.bfloat16)                    # (768, 512)
    b1f = ((b1 - rmean) * scale + beta).astype(jnp.float32)            # (1, 512)

    H2P = _round_up(h2, 128)
    NTP = _round_up(num_tasks, 128)
    w2p = jnp.pad(w2, ((0, 0), (0, H2P - h2))).astype(jnp.bfloat16)                 # (512, 384)
    b2p = jnp.pad(b2, ((0, 0), (0, H2P - h2))).astype(jnp.float32)                  # (1, 384)
    w3p = jnp.pad(w3, ((0, H2P - h2), (0, NTP - num_tasks))).astype(jnp.bfloat16)   # (384, 128)
    b3p = jnp.pad(b3, ((0, 0), (0, NTP - num_tasks))).astype(jnp.float32)           # (1, 128)
    return (w1f, b1f, w2p, b2p, w3p, b3p)


# ---------------------------------------------------------------------------
# Forward wrapper
# ---------------------------------------------------------------------------
def graphpred_forward(last_state, head_params, *, num_tasks, b_tile=None, t_tile=None):
    """last_state: (T, B, 768), time-major (fairseq convention). Returns (B, num_tasks)."""
    T, B, D = last_state.shape
    w1f, b1f, w2p, b2p, w3p, b3p = head_params
    NTP = w3p.shape[1]

    # Stream activations in bf16 (the dominant HBM traffic). Ideally the encoder already
    # emits bf16 so this cast is a no-op; the in-kernel sum still accumulates in f32.
    x = last_state if last_state.dtype == jnp.bfloat16 else last_state.astype(jnp.bfloat16)

    x_buf_bytes, vmem_limit = _tpu_memory_budget()

    # --- B tiles ('parallel'): >= 2 tiles whenever possible so both v7x TensorCores get
    #     work; multiples of 16 keep bf16 (16,128) sublane packing aligned. The ragged
    #     last B tile needs no padding: Pallas drops out-of-bounds writes and the garbage
    #     from out-of-bounds reads stays confined to rows that are dropped.
    if b_tile is not None:
        Bb = b_tile
    elif B >= 32:
        Bb = min(256, _round_up(_cdiv(B, 2), 16))
    else:
        Bb = B      # tiny batch: single tile (one TC on v7x; batch more graphs per call)
    grid_b = _cdiv(B, Bb)

    # --- T tiles (reduction, trailing 'arbitrary' axis): per-generation byte budget for
    #     each (double-buffered) x block. A ragged last T tile is handled in-kernel.
    if t_tile is not None:
        Tt = t_tile
    else:
        row_bytes = Bb * D * jnp.dtype(x.dtype).itemsize
        Tt = max(1, min(T, x_buf_bytes // max(row_bytes, 1)))
    grid_t = _cdiv(T, Tt)

    kern = functools.partial(graphpred_head_kernel, t_total=T, t_tile=Tt)

    out = pl.pallas_call(
        kern,
        grid=(grid_b, grid_t),
        in_specs=[
            pl.BlockSpec((Tt, Bb, D), lambda b, t: (t, b, 0)),
            # Weights/biases: constant index maps -> VMEM-resident across the whole grid.
            pl.BlockSpec(w1f.shape, lambda b, t: (0, 0)),
            pl.BlockSpec(b1f.shape, lambda b, t: (0, 0)),
            pl.BlockSpec(w2p.shape, lambda b, t: (0, 0)),
            pl.BlockSpec(b2p.shape, lambda b, t: (0, 0)),
            pl.BlockSpec(w3p.shape, lambda b, t: (0, 0)),
            pl.BlockSpec(b3p.shape, lambda b, t: (0, 0)),
        ],
        out_specs=pl.BlockSpec((Bb, NTP), lambda b, t: (b, 0)),
        out_shape=jax.ShapeDtypeStruct((B, NTP), jnp.float32),
        scratch_shapes=[pltpu.VMEM((Bb, D), jnp.float32)],
        compiler_params=pltpu.CompilerParams(
            dimension_semantics=("parallel", "arbitrary"),
            vmem_limit_bytes=vmem_limit,
        ),
    )(x, w1f, b1f, w2p, b2p, w3p, b3p)

    return out[:, :num_tasks]


# ---------------------------------------------------------------------------
# Params + references
# ---------------------------------------------------------------------------
def init_params(key, emb_dim_in=768, h1=512, h2=300, num_tasks=1):
    """Synthetic init matching the PyTorch layer shapes (weights stored as (in, out)).
    Linears: xavier-uniform / zero bias (as in the module). BatchNorm running stats are
    randomized (instead of the default 1/0/0/1) to exercise the BN-fold path."""
    k1, k2, k3, k4, k5, k6, k7 = jax.random.split(key, 7)

    def xavier(k, fan_in, fan_out):
        bound = math.sqrt(6.0 / (fan_in + fan_out))
        return jax.random.uniform(k, (fan_in, fan_out), jnp.float32, -bound, bound)

    w1 = xavier(k1, emb_dim_in, h1)
    b1 = jnp.zeros((1, h1), jnp.float32)
    gamma = jax.random.uniform(k4, (1, h1), jnp.float32, 0.5, 1.5)
    beta = 0.1 * jax.random.normal(k5, (1, h1), jnp.float32)
    rmean = 0.1 * jax.random.normal(k6, (1, h1), jnp.float32)
    rvar = jax.random.uniform(k7, (1, h1), jnp.float32, 0.5, 1.5)
    w2 = xavier(k2, h1, h2)
    b2 = jnp.zeros((1, h2), jnp.float32)
    w3 = xavier(k3, h2, num_tasks)
    b3 = jnp.zeros((1, num_tasks), jnp.float32)
    return (w1, b1, gamma, beta, rmean, rvar, w2, b2, w3, b3)


def reference_forward_f32(last_state, params):
    """Pure-JAX float32 reference matching the PyTorch eval-mode forward."""
    (w1, b1, gamma, beta, rmean, rvar, w2, b2, w3, b3) = params
    x = last_state.astype(jnp.float32)
    emb = jnp.mean(jnp.transpose(x, (1, 0, 2)), axis=1)
    h = emb @ w1 + b1
    h = (h - rmean) / jnp.sqrt(rvar + 1e-5) * gamma + beta
    h = jnp.maximum(h, 0.0)
    h = jnp.maximum(h @ w2 + b2, 0.0)
    return h @ w3 + b3


def reference_forward_bf16(last_state, head_params, num_tasks):
    """Reference that mirrors the kernel's bf16-weight / f32-accumulate numerics
    (BatchNorm + 1/T folded into the first linear)."""
    w1f, b1f, w2p, b2p, w3p, b3p = head_params
    s = jnp.sum(last_state.astype(jnp.float32), axis=0).astype(jnp.bfloat16)
    h = jnp.dot(s, w1f, preferred_element_type=jnp.float32) + b1f
    h = jnp.maximum(h, 0.0).astype(jnp.bfloat16)
    h = jnp.dot(h, w2p, preferred_element_type=jnp.float32) + b2p
    h = jnp.maximum(h, 0.0).astype(jnp.bfloat16)
    out = jnp.dot(h, w3p, preferred_element_type=jnp.float32) + b3p
    return out[:, :num_tasks]


if __name__ == "__main__":
    key = jax.random.PRNGKey(0)
    k_x1, k_x2, k_p = jax.random.split(key, 3)

    D = 768            # fixed by Linear(768, 512)
    num_tasks = 1
    params = init_params(k_p, emb_dim_in=D, num_tasks=num_tasks)

    # --- Test 1: tiny demo shapes, single tile. Encoder output arrives in bf16. ---
    T1, B1 = 8, 4
    last_state1 = jax.random.normal(k_x1, (T1, B1, D), jnp.float32).astype(jnp.bfloat16)
    head1 = prepare_head_params(params, seq_len=T1)          # one-time prep (hoisted)

    fwd1 = jax.jit(functools.partial(graphpred_forward, num_tasks=num_tasks))
    out1 = jax.block_until_ready(fwd1(last_state1, head1))
    assert out1.shape == (B1, num_tasks), out1.shape
    ref1_bf16 = reference_forward_bf16(last_state1, head1, num_tasks)
    ref1_f32 = reference_forward_f32(last_state1, params)
    assert jnp.allclose(out1, ref1_bf16, atol=2e-3, rtol=2e-3), (out1, ref1_bf16)
    assert jnp.allclose(out1, ref1_f32, atol=5e-2, rtol=5e-2), (out1, ref1_f32)

    # --- Test 2: multi-tile grid (2 B tiles incl. a ragged one, 2 T tiles). ---
    T2, B2 = 8, 40
    last_state2 = jax.random.normal(k_x2, (T2, B2, D), jnp.float32).astype(jnp.bfloat16)
    head2 = prepare_head_params(params, seq_len=T2)

    fwd2 = jax.jit(functools.partial(graphpred_forward, num_tasks=num_tasks, t_tile=4))
    out2 = jax.block_until_ready(fwd2(last_state2, head2))
    assert out2.shape == (B2, num_tasks), out2.shape
    ref2_bf16 = reference_forward_bf16(last_state2, head2, num_tasks)
    ref2_f32 = reference_forward_f32(last_state2, params)
    assert jnp.allclose(out2, ref2_bf16, atol=2e-3, rtol=2e-3), (out2, ref2_bf16)
    assert jnp.allclose(out2, ref2_f32, atol=5e-2, rtol=5e-2), (out2, ref2_f32)

    print("KERNEL_OK")
</pallas_src>

<mosaic_0001>
module attributes {stable_mosaic.version = 11 : i64} {
  func.func @graphpred_head_kernel(%arg0: i32, %arg1: i32, %arg2: memref<8x4x768xbf16, #tpu.memory_space<vmem>>, %arg3: memref<768x512xbf16, #tpu.memory_space<vmem>>, %arg4: memref<1x512xf32, #tpu.memory_space<vmem>>, %arg5: memref<512x384xbf16, #tpu.memory_space<vmem>>, %arg6: memref<1x384xf32, #tpu.memory_space<vmem>>, %arg7: memref<384x128xbf16, #tpu.memory_space<vmem>>, %arg8: memref<1x128xf32, #tpu.memory_space<vmem>>, %arg9: memref<4x128xf32, #tpu.memory_space<vmem>>, %arg10: memref<4x768xf32, #tpu.memory_space<vmem>>) attributes {dimension_semantics = [#tpu.dimension_semantics<parallel>, #tpu.dimension_semantics<arbitrary>], iteration_bounds = array<i64: 1, 1>, scalar_prefetch = 0 : i64, scratch_operands = 1 : i64, tpu.core_type = #tpu.core_type<tc>, window_params = [{transform_indices = @transform_0, window_bounds = array<i64: 8, 4, 768>}, {pipeline_mode = #tpu.pipeline_mode<synchronous>, transform_indices = @transform_1, window_bounds = array<i64: 768, 512>}, {pipeline_mode = #tpu.pipeline_mode<synchronous>, transform_indices = @transform_2, window_bounds = array<i64: 1, 512>}, {pipeline_mode = #tpu.pipeline_mode<synchronous>, transform_indices = @transform_3, window_bounds = array<i64: 512, 384>}, {pipeline_mode = #tpu.pipeline_mode<synchronous>, transform_indices = @transform_4, window_bounds = array<i64: 1, 384>}, {pipeline_mode = #tpu.pipeline_mode<synchronous>, transform_indices = @transform_5, window_bounds = array<i64: 384, 128>}, {pipeline_mode = #tpu.pipeline_mode<synchronous>, transform_indices = @transform_6, window_bounds = array<i64: 1, 128>}, {transform_indices = @transform_7, window_bounds = array<i64: 4, 128>}]} {
    %c0_i32 = arith.constant 0 : i32
    %0 = arith.cmpi eq, %arg1, %c0_i32 : i32
    %1 = arith.extui %0 : i1 to i32
    %c0_i32_0 = arith.constant 0 : i32
    %2 = arith.cmpi ne, %1, %c0_i32_0 : i32
    scf.if %2 {
      %cst_9 = arith.constant 0.000000e+00 : f32
      %12 = vector.broadcast %cst_9 : f32 to vector<4x768xf32>
      %c0_10 = arith.constant 0 : index
      %c0_11 = arith.constant 0 : index
      %13 = vector.load %arg10[%c0_10, %c0_11] : memref<4x768xf32, #tpu.memory_space<vmem>>, vector<4x768xf32>
      tpu.vector_store %arg10[%c0_10, %c0_11], %12 {strides = array<i32>} : memref<4x768xf32, #tpu.memory_space<vmem>>, vector<4x768xf32>,
    } else {
    }
    %c0 = arith.constant 0 : index
    %c0_1 = arith.constant 0 : index
    %3 = vector.load %arg10[%c0, %c0_1] : memref<4x768xf32, #tpu.memory_space<vmem>>, vector<4x768xf32>
    %c0_2 = arith.constant 0 : index
    %c0_3 = arith.constant 0 : index
    %c0_4 = arith.constant 0 : index
    %4 = vector.load %arg2[%c0_2, %c0_3, %c0_4] : memref<8x4x768xbf16, #tpu.memory_space<vmem>>, vector<8x4x768xbf16>
    %5 = arith.extf %4 : vector<8x4x768xbf16> to vector<8x4x768xf32>
    %cst = arith.constant dense<0.000000e+00> : vector<4x768xf32>
    %6 = vector.multi_reduction <add>, %5, %cst [0] : vector<8x4x768xf32> to vector<4x768xf32>
    %7 = arith.addf %3, %6 : vector<4x768xf32>
    %c0_5 = arith.constant 0 : index
    %c0_6 = arith.constant 0 : index
    %8 = vector.load %arg10[%c0_5, %c0_6] : memref<4x768xf32, #tpu.memory_space<vmem>>, vector<4x768xf32>
    tpu.vector_store %arg10[%c0_5, %c0_6], %7 {strides = array<i32>} : memref<4x768xf32, #tpu.memory_space<vmem>>, vector<4x768xf32>,
    %c0_i32_7 = arith.constant 0 : i32
    %9 = arith.cmpi eq, %arg1, %c0_i32_7 : i32
    %10 = arith.extui %9 : i1 to i32
    %c0_i32_8 = arith.constant 0 : i32
    %11 = arith.cmpi ne, %10, %c0_i32_8 : i32
    scf.if %11 {
      %c0_9 = arith.constant 0 : index
      %c0_10 = arith.constant 0 : index
      %12 = vector.load %arg10[%c0_9, %c0_10] : memref<4x768xf32, #tpu.memory_space<vmem>>, vector<4x768xf32>
      %13 = arith.truncf %12 : vector<4x768xf32> to vector<4x768xbf16>
      %c0_11 = arith.constant 0 : index
      %c0_12 = arith.constant 0 : index
      %14 = vector.load %arg3[%c0_11, %c0_12] : memref<768x512xbf16, #tpu.memory_space<vmem>>, vector<768x512xbf16>
      %cst_13 = arith.constant dense<0.000000e+00> : vector<4x512xf32>
      %15 = tpu.matmul %13, %14, %cst_13 {dimension_numbers = #tpu.dot_dimension_numbers<[1], [0], [0], [1], [0, 0, 1, 1], [], []>} : vector<4x768xbf16>, vector<768x512xbf16>, vector<4x512xf32> -> vector<4x512xf32>
      %c0_14 = arith.constant 0 : index
      %c0_15 = arith.constant 0 : index
      %16 = vector.load %arg4[%c0_14, %c0_15] : memref<1x512xf32, #tpu.memory_space<vmem>>, vector<1x512xf32>
      %17 = vector.broadcast %16 : vector<1x512xf32> to vector<4x512xf32>
      %18 = arith.addf %15, %17 : vector<4x512xf32>
      %cst_16 = arith.constant 0.000000e+00 : f32
      %19 = vector.broadcast %cst_16 : f32 to vector<4x512xf32>
      %20 = arith.maximumf %18, %19 : vector<4x512xf32>
      %21 = arith.truncf %20 : vector<4x512xf32> to vector<4x512xbf16>
      %c0_17 = arith.constant 0 : index
      %c0_18 = arith.constant 0 : index
      %22 = vector.load %arg5[%c0_17, %c0_18] : memref<512x384xbf16, #tpu.memory_space<vmem>>, vector<512x384xbf16>
      %cst_19 = arith.constant dense<0.000000e+00> : vector<4x384xf32>
      %23 = tpu.matmul %21, %22, %cst_19 {dimension_numbers = #tpu.dot_dimension_numbers<[1], [0], [0], [1], [0, 0, 1, 1], [], []>} : vector<4x512xbf16>, vector<512x384xbf16>, vector<4x384xf32> -> vector<4x384xf32>
      %c0_20 = arith.constant 0 : index
      %c0_21 = arith.constant 0 : index
      %24 = vector.load %arg6[%c0_20, %c0_21] : memref<1x384xf32, #tpu.memory_space<vmem>>, vector<1x384xf32>
      %25 = vector.broadcast %24 : vector<1x384xf32> to vector<4x384xf32>
      %26 = arith.addf %23, %25 : vector<4x384xf32>
      %cst_22 = arith.constant 0.000000e+00 : f32
      %27 = vector.broadcast %cst_22 : f32 to vector<4x384xf32>
      %28 = arith.maximumf %26, %27 : vector<4x384xf32>
      %29 = arith.truncf %28 : vector<4x384xf32> to vector<4x384xbf16>
      %c0_23 = arith.constant 0 : index
      %c0_24 = arith.constant 0 : index
      %30 = vector.load %arg7[%c0_23, %c0_24] : memref<384x128xbf16, #tpu.memory_space<vmem>>, vector<384x128xbf16>
      %cst_25 = arith.constant dense<0.000000e+00> : vector<4x128xf32>
      %31 = tpu.matmul %29, %30, %cst_25 {dimension_numbers = #tpu.dot_dimension_numbers<[1], [0], [0], [1], [0, 0, 1, 1], [], []>} : vector<4x384xbf16>, vector<384x128xbf16>, vector<4x128xf32> -> vector<4x128xf32>
      %c0_26 = arith.constant 0 : index
      %c0_27 = arith.constant 0 : index
      %32 = vector.load %arg8[%c0_26, %c0_27] : memref<1x128xf32, #tpu.memory_space<vmem>>, vector<1x128xf32>
      %33 = vector.broadcast %32 : vector<1x128xf32> to vector<4x128xf32>
      %34 = arith.addf %31, %33 : vector<4x128xf32>
      %c0_28 = arith.constant 0 : index
      %c0_29 = arith.constant 0 : index
      %35 = vector.load %arg9[%c0_28, %c0_29] : memref<4x128xf32, #tpu.memory_space<vmem>>, vector<4x128xf32>
      tpu.vector_store %arg9[%c0_28, %c0_29], %34 {strides = array<i32>} : memref<4x128xf32, #tpu.memory_space<vmem>>, vector<4x128xf32>,
    } else {
    }
    return
  }
  func.func @transform_0(%arg0: i32, %arg1: i32) -> (i32, i32, i32) {
    %c0_i32 = arith.constant 0 : i32
    %c0_i32_0 = arith.constant 0 : i32
    return %arg1, %arg0, %c0_i32 : i32, i32, i32
  }
  func.func @transform_1(%arg0: i32, %arg1: i32) -> (i32, i32) {
    %c0_i32 = arith.constant 0 : i32
    %c0_i32_0 = arith.constant 0 : i32
    %c0_i32_1 = arith.constant 0 : i32
    return %c0_i32, %c0_i32_0 : i32, i32
  }
  func.func @transform_2(%arg0: i32, %arg1: i32) -> (i32, i32) {
    %c0_i32 = arith.constant 0 : i32
    %c0_i32_0 = arith.constant 0 : i32
    %c0_i32_1 = arith.constant 0 : i32
    return %c0_i32, %c0_i32_0 : i32, i32
  }
  func.func @transform_3(%arg0: i32, %arg1: i32) -> (i32, i32) {
    %c0_i32 = arith.constant 0 : i32
    %c0_i32_0 = arith.constant 0 : i32
    %c0_i32_1 = arith.constant 0 : i32
    return %c0_i32, %c0_i32_0 : i32, i32
  }
  func.func @transform_4(%arg0: i32, %arg1: i32) -> (i32, i32) {
    %c0_i32 = arith.constant 0 : i32
    %c0_i32_0 = arith.constant 0 : i32
    %c0_i32_1 = arith.constant 0 : i32
    return %c0_i32, %c0_i32_0 : i32, i32
  }
  func.func @transform_5(%arg0: i32, %arg1: i32) -> (i32, i32) {
    %c0_i32 = arith.constant 0 : i32
    %c0_i32_0 = arith.constant 0 : i32
    %c0_i32_1 = arith.constant 0 : i32
    return %c0_i32, %c0_i32_0 : i32, i32
  }
  func.func @transform_6(%arg0: i32, %arg1: i32) -> (i32, i32) {
    %c0_i32 = arith.constant 0 : i32
    %c0_i32_0 = arith.constant 0 : i32
    %c0_i32_1 = arith.constant 0 : i32
    return %c0_i32, %c0_i32_0 : i32, i32
  }
  func.func @transform_7(%arg0: i32, %arg1: i32) -> (i32, i32) {
    %c0_i32 = arith.constant 0 : i32
    %c0_i32_0 = arith.constant 0 : i32
    return %arg0, %c0_i32 : i32, i32
  }
}

</mosaic_0001>

<bundles_post_ra>
// kernel: graphpred_forward.1
= control target key start
LH: loop header
LB: loop body
LE: loop exit
PB: predicated region body
PF: predicated region fallthrough
CT: control target
= control target key end

     0   :  { %12 = vsyncpa [#allocation4], 0  ;;  %s4883_s0 = inlined_call_operand.hbm [shape: bf16[8,4,768], index: 0, kind: input, shape index: {}]   ;;  %s4884_s1 = inlined_call_operand.hbm [shape: bf16[768,512], index: 1, kind: input, shape index: {}]   ;;  %s4885_s2 = inlined_call_operand.hbm [shape: f32[1,512], index: 2, kind: input, shape index: {}]   ;;  %s4886_s3 = inlined_call_operand.hbm [shape: bf16[512,384], index: 3, kind: input, shape index: {}]   ;;  %s4887_s4 = inlined_call_operand.vmem [shape: f32[1,384], index: 4, kind: input, shape index: {}]   ;;  %s4888_s5 = inlined_call_operand.hbm [shape: bf16[384,128], index: 5, kind: input, shape index: {}]   ;;  %s4889_s6 = inlined_call_operand.vmem [shape: f32[1,128], index: 6, kind: input, shape index: {}]   ;;  %s4890_s7 = inlined_call_operand.vmem [shape: f32[4,128], index: 7, kind: output, shape index: {}]  }
   0x1   :  { %13 = vsyncpa [#allocation6], 0  ;;  %s32_s26 = sshll.u32 %s4884_s1, 4  ;;  %s33_s26 = int_to_ptr.hbm [resolvable:$true] %s32_s26 }
   0x2   :  { %14 = vsyncpa [#allocation9], 0  ;;  %s4676_s27 = smov [#allocation5]   ;;  %s4677_s29 = smov 256  }
   0x3   :  { %s34_s28 = sshll.u32 %s4676_s27, 4  ;;  %s4678_s30 = smov 16   ;;  %s35_s28 = int_to_ptr.vmem [resolvable:$true] %s34_s28 }
   0x4   :  { %40 = dma.hbm_to_vmem [thread:$0]  %s33_s26, 24576, %s35_s28, [#allocation6], %s4677_s29, %s4677_s29, %s4678_s30  }
   0x5   :  { %s56_s10 = sshll.u32 %s4886_s3, 4  ;;  %s4679_s11 = smov [#allocation8]   ;;  %s57_s10 = int_to_ptr.hbm [resolvable:$true] %s56_s10 }
   0x6   :  { %s58_s12 = sshll.u32 %s4679_s11, 4  ;;  %s19_s15 = sshll.u32 %s4883_s0, 4  ;;  %s59_s12 = int_to_ptr.vmem [resolvable:$true] %s58_s12  ;;  %s20_s15 = int_to_ptr.hbm [resolvable:$true] %s19_s15 }
   0x7   :  { %s4680_s1 = smov 192   ;;  %s4681_s16 = smov 12  }
   0x8   :  { %64 = dma.hbm_to_vmem [thread:$0]  %s57_s10, 12288, %s59_s12, [#allocation9], %s4680_s1, %s4680_s1, %s4681_s16  }
   0x9   :  { %s46_s19 = sshll.u32 %s4885_s2, 4  ;;  %s4682_s20 = smov [#allocation3]   ;;  %s47_s19 = int_to_ptr.hbm [resolvable:$true] %s46_s19 }
   0xa   :  { %s21_s21 = sshll.u32 %s4682_s20, 4  ;;  %s4683_s3 = smov [#allocation7]   ;;  %s22_s21 = int_to_ptr.vmem [resolvable:$true] %s21_s21 }
   0xb   :  { %27 = dma.hbm_to_vmem [thread:$0]  %s20_s15, 1536, %s22_s21, [#allocation4], %s4680_s1, %s4680_s1, %s4681_s16  }
   0xc   :  { %s48_s22 = sshll.u32 %s4683_s3, 4  ;;  %s71_s0 = sshll.u32 %s4888_s5, 4  ;;  %s49_s22 = int_to_ptr.vmem [resolvable:$true] %s48_s22  ;;  %s72_s0 = int_to_ptr.hbm [resolvable:$true] %s71_s0 }
   0xd   :  { %51 = dma.hbm_to_vmem [thread:$0]  %s47_s19, 64, %s49_s22, [#allocation6]  }
   0xe   :  { %s4684_s25 = smov [#allocation10]   ;;  %s4685_s27 = smov 64  }
   0xf   :  { %s73_s26 = sshll.u32 %s4684_s25, 4  ;;  %s4686_s28 = smov 4   ;;  %s74_s26 = int_to_ptr.vmem [resolvable:$true] %s73_s26 }
  0x10   :  { %79 = dma.hbm_to_vmem [thread:$0]  %s72_s0, 3072, %s74_s26, [#allocation9], %s4685_s27, %s4685_s27, %s4686_s28  }
  0x11   :  { %4670 = dma.done.wait [#allocation4], 1536  }
  0x12   :  { %4671 = vsyncadd [#allocation4], 4294965760 }
  0x13   :  { %4672 = dma.done.wait [#allocation6], 24640  }
  0x14   :  { %4673 = vsyncadd [#allocation6], 4294942656 }
  0x15   :  { %4674 = dma.done.wait [#allocation9], 15360  }
  0x16   :  { %4675 = vsyncadd [#allocation9], 4294951936  ;;  %v3092_v0 = vld [vmem:[#allocation5 + $0xe0] sm:$0xf]  ;;  %v4256_v1 = vld [vmem:[#allocation5 + $0xec] sm:$0xf0] }
  0x17   :  { %v3220_v2 = vld [vmem:[#allocation5 + $0x1e0] sm:$0xf]  ;;  %v3093_v3 = vor.u32 %v4256_v1, %v3092_v0  ;;  %v4288_v4 = vld [vmem:[#allocation5 + $0x1ec] sm:$0xf0]  ;;  %vm299_vm0 = vcmask 1043456  }
  0x18   :  { %v3348_v5 = vld [vmem:[#allocation5 + $0x2e0] sm:$0xf]  ;;  %v4320_v6 = vld [vmem:[#allocation5 + $0x2ec] sm:$0xf0]  ;;  %v3221_v7 = vor.u32 %v4288_v4, %v3220_v2 }
  0x19   :  { %v3349_v8 = vor.u32 %v4320_v6, %v3348_v5  ;;  %v3476_v9 = vld [vmem:[#allocation5 + $0x3e0] sm:$0xf]  ;;  %v4352_v10 = vld [vmem:[#allocation5 + $0x3ec] sm:$0xf0]  ;;  %1605 = vmatpush.bf16.msra.mxu0 %v3093_v3 }
  0x1a   :  { %v3076_v11 = vld [vmem:[#allocation5 + $0xc0] sm:$0xf]  ;;  %v3477_v12 = vor.u32 %v4352_v10, %v3476_v9  ;;  %v4252_v13 = vld [vmem:[#allocation5 + $0xcc] sm:$0xf0]  ;;  %1618 = vmatpush.bf16.msra.mxu1 %v3221_v7 }
  0x1b   :  { %v3204_v14 = vld [vmem:[#allocation5 + $0x1c0] sm:$0xf]  ;;  %v4284_v15 = vld [vmem:[#allocation5 + $0x1cc] sm:$0xf0]  ;;  %1631 = vmatpush.bf16.msra.mxu2 %v3349_v8  ;;  %v3077_v16 = vor.u32 %v4252_v13, %v3076_v11 }
  0x1c   :  { %v3205_v17 = vor.u32 %v4284_v15, %v3204_v14  ;;  %v3332_v18 = vld [vmem:[#allocation5 + $0x2c0] sm:$0xf]  ;;  %v4316_v19 = vld [vmem:[#allocation5 + $0x2cc] sm:$0xf0]  ;;  %1644 = vmatpush.bf16.msra.mxu3 %v3477_v12 }
  0x1d   :  { %v3460_v20 = vld [vmem:[#allocation5 + $0x3c0] sm:$0xf]  ;;  %v3333_v21 = vor.u32 %v4316_v19, %v3332_v18  ;;  %v4348_v22 = vld [vmem:[#allocation5 + $0x3cc] sm:$0xf0]  ;;  %1606 = vmatpush.bf16.msra.mxu0 %v3077_v16 }
  0x1e   :  { %v3060_v23 = vld [vmem:[#allocation5 + $0xa0] sm:$0xf]  ;;  %v4248_v24 = vld [vmem:[#allocation5 + $0xac] sm:$0xf0]  ;;  %v3461_v25 = vor.u32 %v4348_v22, %v3460_v20  ;;  %1619 = vmatpush.bf16.msra.mxu1 %v3205_v17 }
  0x1f   :  { %v3188_v26 = vld [vmem:[#allocation5 + $0x1a0] sm:$0xf]  ;;  %v4280_v27 = vld [vmem:[#allocation5 + $0x1ac] sm:$0xf0]  ;;  %v3061_v29 = vor.u32 %v4248_v24, %v3060_v23  ;;  %1632 = vmatpush.bf16.msra.mxu2 %v3333_v21 }
  0x20   :  { %v3316_v28 = vld [vmem:[#allocation5 + $0x2a0] sm:$0xf]  ;;  %v4312_v30 = vld [vmem:[#allocation5 + $0x2ac] sm:$0xf0]  ;;  %v3189_v33 = vor.u32 %v4280_v27, %v3188_v26  ;;  %1645 = vmatpush.bf16.msra.mxu3 %v3461_v25 }
  0x21   :  { %v3444_v31 = vld [vmem:[#allocation5 + $0x3a0] sm:$0xf]  ;;  %v4344_v32 = vld [vmem:[#allocation5 + $0x3ac] sm:$0xf0]  ;;  %v3317_v34 = vor.u32 %v4312_v30, %v3316_v28  ;;  %1607 = vmatpush.bf16.msra.mxu0 %v3061_v29 }
  0x22   :  { %v3044_v35 = vld [vmem:[#allocation5 + $0x80] sm:$0xf]  ;;  %v4244_v36 = vld [vmem:[#allocation5 + $0x8c] sm:$0xf0]  ;;  %v3445_v38 = vor.u32 %v4344_v32, %v3444_v31  ;;  %1620 = vmatpush.bf16.msra.mxu1 %v3189_v33  ;;  %v4254_v33 = vld [vmem:[#allocation5 + $0xe4] sm:$0xf] }
  0x23   :  { %v3172_v37 = vld [vmem:[#allocation5 + $0x180] sm:$0xf]  ;;  %v4276_v39 = vld [vmem:[#allocation5 + $0x18c] sm:$0xf0]  ;;  %v3045_v44 = vor.u32 %v4244_v36, %v3044_v35  ;;  %1633 = vmatpush.bf16.msra.mxu2 %v3317_v34  ;;  %v3094_v34 = vld [vmem:[#allocation5 + $0xf0] sm:$0xf0] }
  0x24   :  { %v3300_v40 = vld [vmem:[#allocation5 + $0x280] sm:$0xf]  ;;  %v4308_v41 = vld [vmem:[#allocation5 + $0x28c] sm:$0xf0]  ;;  %v3173_v45 = vor.u32 %v4276_v39, %v3172_v37  ;;  %1646 = vmatpush.bf16.msra.mxu3 %v3445_v38  ;;  %v4286_v37 = vld [vmem:[#allocation5 + $0x1e4] sm:$0xf] }
  0x25   :  { %v3428_v42 = vld [vmem:[#allocation5 + $0x380] sm:$0xf]  ;;  %v4340_v43 = vld [vmem:[#allocation5 + $0x38c] sm:$0xf0]  ;;  %v3301_v46 = vor.u32 %v4308_v41, %v3300_v40  ;;  %1608 = vmatpush.bf16.msra.mxu0 %v3045_v44  ;;  %v3222_v38 = vld [vmem:[#allocation5 + $0x1f0] sm:$0xf0] }
  0x26   :  { %v3028_v47 = vld [vmem:[#allocation5 + $0x60] sm:$0xf]  ;;  %v4240_v48 = vld [vmem:[#allocation5 + $0x6c] sm:$0xf0]  ;;  %v3429_v50 = vor.u32 %v4340_v43, %v3428_v42  ;;  %1621 = vmatpush.bf16.msra.mxu1 %v3173_v45  ;;  %v3097_v42 = vor.u32 %v4254_v33, %v3094_v34 }
  0x27   :  { %v3156_v49 = vld [vmem:[#allocation5 + $0x160] sm:$0xf]  ;;  %v4272_v51 = vld [vmem:[#allocation5 + $0x16c] sm:$0xf0]  ;;  %v3029_v56 = vor.u32 %v4240_v48, %v3028_v47  ;;  %1634 = vmatpush.bf16.msra.mxu2 %v3301_v46  ;;  %v3225_v46 = vor.u32 %v4286_v37, %v3222_v38  ;;  %v4250_v48 = vld [vmem:[#allocation5 + $0xc4] sm:$0xf] }
  0x28   :  { %v3284_v52 = vld [vmem:[#allocation5 + $0x260] sm:$0xf]  ;;  %v4304_v53 = vld [vmem:[#allocation5 + $0x26c] sm:$0xf0]  ;;  %v3157_v57 = vor.u32 %v4272_v51, %v3156_v49  ;;  %1647 = vmatpush.bf16.msra.mxu3 %v3429_v50  ;;  %v3078_v49 = vld [vmem:[#allocation5 + $0xd0] sm:$0xf0] }
  0x29   :  { %v3412_v54 = vld [vmem:[#allocation5 + $0x360] sm:$0xf]  ;;  %v4336_v55 = vld [vmem:[#allocation5 + $0x36c] sm:$0xf0]  ;;  %v3285_v58 = vor.u32 %v4304_v53, %v3284_v52  ;;  %1609 = vmatpush.bf16.msra.mxu0 %v3029_v56  ;;  %v4282_v50 = vld [vmem:[#allocation5 + $0x1c4] sm:$0xf] }
  0x2a   :  { %v3012_v59 = vld [vmem:[#allocation5 + $0x40] sm:$0xf]  ;;  %v4236_v60 = vld [vmem:[#allocation5 + $0x4c] sm:$0xf0]  ;;  %v3413_v62 = vor.u32 %v4336_v55, %v3412_v54  ;;  %1622 = vmatpush.bf16.msra.mxu1 %v3157_v57  ;;  %v3206_v51 = vld [vmem:[#allocation5 + $0x1d0] sm:$0xf0]  ;;  %v3081_v54 = vor.u32 %v4250_v48, %v3078_v49 }
  0x2b   :  { %v3140_v61 = vld [vmem:[#allocation5 + $0x140] sm:$0xf]  ;;  %v4268_v63 = vld [vmem:[#allocation5 + $0x14c] sm:$0xf0]  ;;  %v3013_v4 = vor.u32 %v4236_v60, %v3012_v59  ;;  %1635 = vmatpush.bf16.msra.mxu2 %v3285_v58  ;;  %v3209_v58 = vor.u32 %v4282_v50, %v3206_v51  ;;  %v4246_v60 = vld [vmem:[#allocation5 + $0xa4] sm:$0xf] }
  0x2c   :  { %v3268_v0 = vld [vmem:[#allocation5 + $0x240] sm:$0xf]  ;;  %v4300_v1 = vld [vmem:[#allocation5 + $0x24c] sm:$0xf0]  ;;  %v3141_v5 = vor.u32 %v4268_v63, %v3140_v61  ;;  %1648 = vmatpush.bf16.msra.mxu3 %v3413_v62  ;;  %v3062_v61 = vld [vmem:[#allocation5 + $0xb0] sm:$0xf0] }
  0x2d   :  { %v3396_v2 = vld [vmem:[#allocation5 + $0x340] sm:$0xf]  ;;  %v4332_v3 = vld [vmem:[#allocation5 + $0x34c] sm:$0xf0]  ;;  %v3269_v6 = vor.u32 %v4300_v1, %v3268_v0  ;;  %1610 = vmatpush.bf16.msra.mxu0 %v3013_v4  ;;  %v4278_v62 = vld [vmem:[#allocation5 + $0x1a4] sm:$0xf] }
  0x2e   :  { %v2996_v7 = vld [vmem:[#allocation5 + $0x20] sm:$0xf]  ;;  %v4232_v8 = vld [vmem:[#allocation5 + $0x2c] sm:$0xf0]  ;;  %v3397_v10 = vor.u32 %v4332_v3, %v3396_v2  ;;  %1623 = vmatpush.bf16.msra.mxu1 %v3141_v5  ;;  %v3190_v63 = vld [vmem:[#allocation5 + $0x1b0] sm:$0xf0]  ;;  %v3065_v2 = vor.u32 %v4246_v60, %v3062_v61 }
  0x2f   :  { %v3124_v9 = vld [vmem:[#allocation5 + $0x120] sm:$0xf]  ;;  %v4264_v11 = vld [vmem:[#allocation5 + $0x12c] sm:$0xf0]  ;;  %v2997_v16 = vor.u32 %v4232_v8, %v2996_v7  ;;  %1636 = vmatpush.bf16.msra.mxu2 %v3269_v6  ;;  %v3193_v6 = vor.u32 %v4278_v62, %v3190_v63  ;;  %v4242_v8 = vld [vmem:[#allocation5 + $0x84] sm:$0xf] }
  0x30   :  { %v3252_v12 = vld [vmem:[#allocation5 + $0x220] sm:$0xf]  ;;  %v4296_v13 = vld [vmem:[#allocation5 + $0x22c] sm:$0xf0]  ;;  %v3125_v19 = vor.u32 %v4264_v11, %v3124_v9  ;;  %1649 = vmatpush.bf16.msra.mxu3 %v3397_v10  ;;  %v3046_v9 = vld [vmem:[#allocation5 + $0x90] sm:$0xf0] }
  0x31   :  { %v3380_v14 = vld [vmem:[#allocation5 + $0x320] sm:$0xf]  ;;  %v4328_v15 = vld [vmem:[#allocation5 + $0x32c] sm:$0xf0]  ;;  %v3253_v20 = vor.u32 %v4296_v13, %v3252_v12  ;;  %1611 = vmatpush.bf16.msra.mxu0 %v2997_v16  ;;  %v4274_v10 = vld [vmem:[#allocation5 + $0x184] sm:$0xf] }
  0x32   :  { %v2980_v17 = vld [vmem:[#allocation5] sm:$0xf]  ;;  %v4228_v18 = vld [vmem:[#allocation5 + $0xc] sm:$0xf0]  ;;  %v3381_v24 = vor.u32 %v4328_v15, %v3380_v14  ;;  %1624 = vmatpush.bf16.msra.mxu1 %v3125_v19  ;;  %v3174_v11 = vld [vmem:[#allocation5 + $0x190] sm:$0xf0] }
  0x33   :  { %v3108_v21 = vld [vmem:[#allocation5 + $0x100] sm:$0xf]  ;;  %v4260_v22 = vld [vmem:[#allocation5 + $0x10c] sm:$0xf0]  ;;  %v2981_v31 = vor.u32 %v4228_v18, %v2980_v17  ;;  %1637 = vmatpush.bf16.msra.mxu2 %v3253_v20  ;;  %v3049_v17 = vor.u32 %v4242_v8, %v3046_v9  ;;  %v4238_v19 = vld [vmem:[#allocation5 + $0x64] sm:$0xf] }
  0x34   :  { %v3236_v23 = vld [vmem:[#allocation5 + $0x200] sm:$0xf]  ;;  %v4292_v25 = vld [vmem:[#allocation5 + $0x20c] sm:$0xf0]  ;;  %v3109_v35 = vor.u32 %v4260_v22, %v3108_v21  ;;  %1650 = vmatpush.bf16.msra.mxu3 %v3381_v24  ;;  %v3177_v21 = vor.u32 %v4274_v10, %v3174_v11  ;;  %v3030_v22 = vld [vmem:[#allocation5 + $0x70] sm:$0xf0] }
  0x35   :  { %v3364_v26 = vld [vmem:[#allocation5 + $0x300] sm:$0xf]  ;;  %v4324_v27 = vld [vmem:[#allocation5 + $0x30c] sm:$0xf0]  ;;  %v3237_v36 = vor.u32 %v4292_v25, %v3236_v23  ;;  %1612 = vmatpush.bf16.msra.mxu0 %v2981_v31  ;;  %v113_v23 = vld [vmem:[#allocation3 + $0x8] sm:$0xf] }
  0x36   :  { %v3604_v28 = vld [vmem:[#allocation5 + $0x4e0] sm:$0xf]  ;;  %v4384_v29 = vld [vmem:[#allocation5 + $0x4ec] sm:$0xf0]  ;;  %v3365_v39 = vor.u32 %v4324_v27, %v3364_v26  ;;  %1625 = vmatpush.bf16.msra.mxu1 %v3109_v35  ;;  %v4270_v26 = vld [vmem:[#allocation5 + $0x164] sm:$0xf]  ;;  %v130_v33 = vunpack.c.l.bf16 %v113_v23  ;;  %v3033_v35 = vor.u32 %v4238_v19, %v3030_v22 }
  0x37   :  { %v3732_v30 = vld [vmem:[#allocation5 + $0x5e0] sm:$0xf]  ;;  %v4416_v32 = vld [vmem:[#allocation5 + $0x5ec] sm:$0xf0]  ;;  %v3605_v40 = vor.u32 %v4384_v29, %v3604_v28  ;;  %1638 = vmatpush.bf16.msra.mxu2 %v3237_v36  ;;  %v3158_v27 = vld [vmem:[#allocation5 + $0x170] sm:$0xf0] }
  0x38   :  { %v3733_v41 = vor.u32 %v4416_v32, %v3732_v30  ;;  %v3588_v43 = vld [vmem:[#allocation5 + $0x4c0] sm:$0xf]  ;;  %v4380_v44 = vld [vmem:[#allocation5 + $0x4cc] sm:$0xf0]  ;;  %1651 = vmatpush.bf16.msra.mxu3 %v3365_v39  ;;  %v4234_v37 = vld [vmem:[#allocation5 + $0x44] sm:$0xf]  ;;  %v3161_v39 = vor.u32 %v4270_v26, %v3158_v27 }
  0x39   :  { %v3716_v45 = vld [vmem:[#allocation5 + $0x5c0] sm:$0xf]  ;;  %v4412_v47 = vld [vmem:[#allocation5 + $0x5cc] sm:$0xf0]  ;;  %1657 = vmatpush.bf16.msrb.mxu0 %v3605_v40  ;;  %v3589_v52 = vor.u32 %v4380_v44, %v3588_v43  ;;  %v3014_v40 = vld [vmem:[#allocation5 + $0x50] sm:$0xf0] }
  0x3a   :  { %1670 = vmatpush.bf16.msrb.mxu1 %v3733_v41  ;;  %v3717_v53 = vor.u32 %v4412_v47, %v3716_v45  ;;  %v3572_v55 = vld [vmem:[#allocation5 + $0x4a0] sm:$0xf]  ;;  %v4376_v56 = vld [vmem:[#allocation5 + $0x4ac] sm:$0xf0]  ;;  %v4266_v41 = vld [vmem:[#allocation5 + $0x144] sm:$0xf]  ;;  %v3017_v49 = vor.u32 %v4234_v37, %v3014_v40 }
  0x3b   :  { %1683 = vmatpush.bf16.msrb.mxu2 %v3097_v42  ;;  %v3700_v57 = vld [vmem:[#allocation5 + $0x5a0] sm:$0xf]  ;;  %v4408_v59 = vld [vmem:[#allocation5 + $0x5ac] sm:$0xf0]  ;;  %v3573_v0 = vor.u32 %v4376_v56, %v3572_v55  ;;  %v3142_v42 = vld [vmem:[#allocation5 + $0x150] sm:$0xf0] }
  0x3c   :  { %1696 = vmatpush.bf16.msrb.mxu3 %v3225_v46  ;;  %v3701_v1 = vor.u32 %v4408_v59, %v3700_v57  ;;  %v3556_v3 = vld [vmem:[#allocation5 + $0x480] sm:$0xf]  ;;  %v4372_v4 = vld [vmem:[#allocation5 + $0x48c] sm:$0xf0]  ;;  %180 = vst [vmem:[#allocation1 + $0x20] ss:$2 sm:$0xff] %v130_v33 }
  0x3d   :  { %1658 = vmatpush.bf16.msrb.mxu0 %v3589_v52  ;;  %v3684_v5 = vld [vmem:[#allocation5 + $0x580] sm:$0xf]  ;;  %v4404_v7 = vld [vmem:[#allocation5 + $0x58c] sm:$0xf0]  ;;  %v3557_v12 = vor.u32 %v4372_v4, %v3556_v3  ;;  %v4230_v50 = vld [vmem:[#allocation5 + $0x24] sm:$0xf] }
  0x3e   :  { %1671 = vmatpush.bf16.msrb.mxu1 %v3717_v53  ;;  %v3540_v13 = vld [vmem:[#allocation5 + $0x460] sm:$0xf]  ;;  %v4368_v14 = vld [vmem:[#allocation5 + $0x46c] sm:$0xf0]  ;;  %v3685_v16 = vor.u32 %v4404_v7, %v3684_v5  ;;  %v2998_v51 = vld [vmem:[#allocation5 + $0x30] sm:$0xf0]  ;;  %v3145_v53 = vor.u32 %v4266_v41, %v3142_v42 }
  0x3f   :  { %1684 = vmatpush.bf16.msrb.mxu2 %v3081_v54  ;;  %v3668_v15 = vld [vmem:[#allocation5 + $0x560] sm:$0xf]  ;;  %v4400_v18 = vld [vmem:[#allocation5 + $0x56c] sm:$0xf0]  ;;  %v3541_v29 = vor.u32 %v4368_v14, %v3540_v13  ;;  %v4262_v54 = vld [vmem:[#allocation5 + $0x124] sm:$0xf]  ;;  %v3001_v4 = vor.u32 %v4230_v50, %v2998_v51 }
  0x40   :  { %1697 = vmatpush.bf16.msrb.mxu3 %v3209_v58  ;;  %v112_v20 = vld [vmem:[#allocation3] sm:$0xff]  ;;  %v4742_v24 = vld [vmem:[#allocation3 + $0xc] sm:$0xff]  ;;  %v3669_v34 = vor.u32 %v4400_v18, %v3668_v15  ;;  %v3126_v55 = vld [vmem:[#allocation5 + $0x130] sm:$0xf0] }
  0x41   :  { %1659 = vmatpush.bf16.msrb.mxu0 %v3573_v0  ;;  %v128_v25 = vunpack.c.l.bf16 %v112_v20  ;;  %v129_v28 = vunpack.c.h.bf16 %v112_v20  ;;  %v3524_v30 = vld [vmem:[#allocation5 + $0x440] sm:$0xf]  ;;  %v4364_v31 = vld [vmem:[#allocation5 + $0x44c] sm:$0xf0]  ;;  %v131_v38 = vunpack.c.l.bf16 %v4742_v24  ;;  %v132_v52 = vunpack.c.h.bf16 %v4742_v24  ;;  %v115_v56 = vld [vmem:[#allocation3 + $0x14] sm:$0xf] }
  0x42   :  { %1672 = vmatpush.bf16.msrb.mxu1 %v3701_v1  ;;  %v3652_v32 = vld [vmem:[#allocation5 + $0x540] sm:$0xf]  ;;  %v4396_v36 = vld [vmem:[#allocation5 + $0x54c] sm:$0xf0]  ;;  %v3525_v45 = vor.u32 %v4364_v31, %v3524_v30  ;;  %v116_v59 = vld [vmem:[#allocation3 + $0x18] sm:$0xff]  ;;  %v133_v8 = vunpack.c.l.bf16 %v115_v56  ;;  %v3129_v9 = vor.u32 %v4262_v54, %v3126_v55 }
  0x43   :  { %1685 = vmatpush.bf16.msrb.mxu2 %v3065_v2  ;;  %176 = vst [vmem:[#allocation1] ss:$2 sm:$0xff] %v128_v25  ;;  %v3508_v43 = vld [vmem:[#allocation5 + $0x420] sm:$0xf]  ;;  %v4360_v44 = vld [vmem:[#allocation5 + $0x42c] sm:$0xf0]  ;;  %v3653_v48 = vor.u32 %v4396_v36, %v3652_v32  ;;  %v134_v10 = vunpack.c.l.bf16 %v116_v59  ;;  %v135_v13 = vunpack.c.h.bf16 %v116_v59 }
  0x44   :  { %1698 = vmatpush.bf16.msrb.mxu3 %v3193_v6  ;;  %178 = vst [vmem:[#allocation1 + $0x10] ss:$2 sm:$0xff] %v129_v28  ;;  %v3636_v46 = vld [vmem:[#allocation5 + $0x520] sm:$0xf]  ;;  %v4392_v47 = vld [vmem:[#allocation5 + $0x52c] sm:$0xf0]  ;;  %v3509_v60 = vor.u32 %v4360_v44, %v3508_v43 }
  0x45   :  { %1660 = vmatpush.bf16.msrb.mxu0 %v3557_v12  ;;  %188 = vst [vmem:[#allocation1 + $0x30] ss:$2 sm:$0xff] %v131_v38  ;;  %v3492_v57 = vld [vmem:[#allocation5 + $0x400] sm:$0xf]  ;;  %v4356_v58 = vld [vmem:[#allocation5 + $0x40c] sm:$0xf0]  ;;  %v3637_v3 = vor.u32 %v4392_v47, %v3636_v46 }
  0x46   :  { %1673 = vmatpush.bf16.msrb.mxu1 %v3685_v16  ;;  %v3620_v61 = vld [vmem:[#allocation5 + $0x500] sm:$0xf]  ;;  %v4388_v62 = vld [vmem:[#allocation5 + $0x50c] sm:$0xf0]  ;;  %v4226_v63 = vld [vmem:[#allocation5 + $0x4] sm:$0xf]  ;;  %v3493_v16 = vor.u32 %v4356_v58, %v3492_v57 }
  0x47   :  { %1686 = vmatpush.bf16.msrb.mxu2 %v3049_v17  ;;  %v2982_v0 = vld [vmem:[#allocation5 + $0x10] sm:$0xf0]  ;;  %v4258_v5 = vld [vmem:[#allocation5 + $0x104] sm:$0xf]  ;;  %v117_v7 = vld [vmem:[#allocation3 + $0x20] sm:$0xf]  ;;  %v3621_v19 = vor.u32 %v4388_v62, %v3620_v61 }
  0x48   :  { %1699 = vmatpush.bf16.msrb.mxu3 %v3177_v21  ;;  %v3110_v6 = vld [vmem:[#allocation5 + $0x110] sm:$0xf0]  ;;  %v4748_v14 = vld.sshfl [vmem:[#allocation1 + $0x20] sm:$0xff pattern:$0x75316420]  ;;  %v2985_v20 = vor.u32 %v4226_v63, %v2982_v0  ;;  %v136_v21 = vunpack.c.l.bf16 %v117_v7  ;;  %v118_v23 = vld [vmem:[#allocation3 + $0x24] sm:$0xff] }
  0x49   :  { %1661 = vmatpush.bf16.msrb.mxu0 %v3541_v29  ;;  %v4750_v15 = vld.sshfl [vmem:[#allocation1 + $0x28] sm:$0xff pattern:$0x75316420]  ;;  %v3113_v22 = vor.u32 %v4258_v5, %v3110_v6  ;;  %v119_v26 = vld [vmem:[#allocation3 + $0x2c] sm:$0xf]  ;;  %v137_v27 = vunpack.c.l.bf16 %v118_v23  ;;  %v120_v30 = vld [vmem:[#allocation3 + $0x30] sm:$0xff]  ;;  %v138_v31 = vunpack.c.h.bf16 %v118_v23 }
  0x4a   :  { %1674 = vmatpush.bf16.msrb.mxu1 %v3669_v34  ;;  %v4746_v1 = vld.sshfl [vmem:[#allocation1] sm:$0xff pattern:$0x75316420]  ;;  %v182_v2 = vld.sshfl [vmem:[#allocation1 + $0x8] sm:$0xff pattern:$0x75316420]  ;;  %v139_v33 = vunpack.c.l.bf16 %v119_v26  ;;  %v140_v36 = vunpack.c.l.bf16 %v120_v30  ;;  %v141_v42 = vunpack.c.h.bf16 %v120_v30 }
  0x4b   :  { %1687 = vmatpush.bf16.msrb.mxu2 %v3033_v35  ;;  %191 = vst [vmem:[#allocation1] ss:$2 sm:$0xff] %v132_v52  ;;  %v183_v11 = vld.sshfl [vmem:[#allocation1 + $0x10] sm:$0xff pattern:$0x75316420]  ;;  %v122_v41 = vld [vmem:[#allocation3 + $0x3c] sm:$0xff] }
  0x4c   :  { %1700 = vmatpush.bf16.msrb.mxu3 %v3161_v39  ;;  %v184_v12 = vld.sshfl [vmem:[#allocation1 + $0x18] sm:$0xff pattern:$0x75316420]  ;;  %v189_v17 = vld.sshfl [vmem:[#allocation1 + $0x30] sm:$0xff pattern:$0x75316420]  ;;  %v144_v57 = vunpack.c.h.bf16 %v122_v41 }
  0x4d   :  { %1662 = vmatpush.bf16.msrb.mxu0 %v3525_v45  ;;  %v190_v18 = vld.sshfl [vmem:[#allocation1 + $0x38] sm:$0xff pattern:$0x75316420]  ;;  %192 = vst [vmem:[#allocation1 + $0x10] ss:$2 sm:$0xff] %v133_v8  ;;  %v315_v43 = vsel %vm299_vm0, %v182_v2, 0.0 }
  0x4e   :  { %1675 = vmatpush.bf16.msrb.mxu1 %v3653_v48  ;;  %197 = vst [vmem:[#allocation1 + $0x20] ss:$2 sm:$0xff] %v134_v10  ;;  %v121_v40 = vld [vmem:[#allocation3 + $0x38] sm:$0xf]  ;;  %v316_v44 = vsel %vm299_vm0, %v190_v18, 0.0  ;;  %v345_v45 = vsel %vm299_vm0, %v184_v12, 0.0 }
  0x4f   :  { %1688 = vmatpush.bf16.msrb.mxu2 %v3017_v49  ;;  %198 = vst [vmem:[#allocation1 + $0x30] ss:$2 sm:$0xff] %v135_v13  ;;  %v123_v47 = vld [vmem:[#allocation3 + $0x44] sm:$0xf]  ;;  %v142_v48 = vunpack.c.l.bf16 %v121_v40  ;;  %v143_v49 = vunpack.c.l.bf16 %v122_v41  ;;  %v300_v52 = vsel %vm299_vm0, %v4746_v1, 0.0  ;;  %v330_v54 = vsel %vm299_vm0, %v183_v11, 0.0 }
  0x50   :  { %1701 = vmatpush.bf16.msrb.mxu3 %v3145_v53  ;;  %v301_v53 = vsel %vm299_vm0, %v189_v17, 0.0  ;;  %v124_v56 = vld [vmem:[#allocation3 + $0x48] sm:$0xff]  ;;  %v317_v2 = vadd.f32 %v316_v44, %v315_v43  ;;  %v375_v5 = vsel %vm299_vm0, %v4750_v15, 0.0  ;;  %v125_v6 = vld [vmem:[#allocation3 + $0x50] sm:$0xf]  ;;  %v360_v8 = vsel %vm299_vm0, %v4748_v14, 0.0 }
  0x51   :  { %1663 = vmatpush.bf16.msrb.mxu0 %v3509_v60  ;;  %v302_v63 = vadd.f32 %v301_v53, %v300_v52  ;;  %v146_v7 = vunpack.c.l.bf16 %v124_v56  ;;  %v147_v26 = vunpack.c.h.bf16 %v124_v56  ;;  %v148_v30 = vunpack.c.l.bf16 %v125_v6 }
  0x52   :  { %1676 = vmatpush.bf16.msrb.mxu1 %v3637_v3  ;;  %v193_v24 = vld.sshfl [vmem:[#allocation1] sm:$0xff pattern:$0x75316420]  ;;  %v194_v25 = vld.sshfl [vmem:[#allocation1 + $0x8] sm:$0xff pattern:$0x75316420]  ;;  %v145_v3 = vunpack.c.l.bf16 %v123_v47 }
  0x53   :  { %1689 = vmatpush.bf16.msrb.mxu2 %v3001_v4  ;;  %203 = vst [vmem:[#allocation1] ss:$2 sm:$0xff] %v136_v21  ;;  %v346_v46 = vsel %vm299_vm0, %v194_v25, 0.0  ;;  %v331_v55 = vsel %vm299_vm0, %v193_v24, 0.0 }
  0x54   :  { %1702 = vmatpush.bf16.msrb.mxu3 %v3129_v9  ;;  %v195_v28 = vld.sshfl [vmem:[#allocation1 + $0x10] sm:$0xff pattern:$0x75316420]  ;;  %v196_v29 = vld.sshfl [vmem:[#allocation1 + $0x18] sm:$0xff pattern:$0x75316420]  ;;  %v332_v17 = vadd.f32 %v331_v55, %v330_v54  ;;  %v347_v18 = vadd.f32 %v346_v46, %v345_v45 }
  0x55   :  { %1664 = vmatpush.bf16.msrb.mxu0 %v3493_v16  ;;  %v199_v32 = vld.sshfl [vmem:[#allocation1 + $0x20] sm:$0xff pattern:$0x75316420]  ;;  %v200_v34 = vld.sshfl [vmem:[#allocation1 + $0x28] sm:$0xff pattern:$0x75316420] }
  0x56   :  { %1677 = vmatpush.bf16.msrb.mxu1 %v3621_v19  ;;  %v201_v35 = vld.sshfl [vmem:[#allocation1 + $0x30] sm:$0xff pattern:$0x75316420]  ;;  %v202_v37 = vld.sshfl [vmem:[#allocation1 + $0x38] sm:$0xff pattern:$0x75316420] }
  0x57   :  { %1690 = vmatpush.bf16.msrb.mxu2 %v2985_v20  ;;  %206 = vst [vmem:[#allocation1 + $0x10] ss:$2 sm:$0xff] %v137_v27  ;;  %v303_v0 = vsel %vm299_vm0, %v199_v32, 0.0  ;;  %v318_v4 = vsel %vm299_vm0, %v200_v34, 0.0  ;;  %v361_v9 = vsel %vm299_vm0, %v195_v28, 0.0  ;;  %v376_v10 = vsel %vm299_vm0, %v196_v29, 0.0 }
  0x58   :  { %1703 = vmatpush.bf16.msrb.mxu3 %v3113_v22  ;;  %207 = vst [vmem:[#allocation1 + $0x20] ss:$2 sm:$0xff] %v138_v31  ;;  %v304_v13 = vadd.f32 %v303_v0, %v302_v63  ;;  %v319_v16 = vadd.f32 %v318_v4, %v317_v2  ;;  %v333_v20 = vsel %vm299_vm0, %v201_v35, 0.0  ;;  %v377_v21 = vadd.f32 %v376_v10, %v375_v5  ;;  %v4772_v22 = vld [vmem:[#allocation3 + $0x54] sm:$0xff] }
  0x59   :  { %208 = vst [vmem:[#allocation1 + $0x30] ss:$2 sm:$0xff] %v139_v33  ;;  %v348_v23 = vsel %vm299_vm0, %v202_v37, 0.0  ;;  %v362_v29 = vadd.f32 %v361_v9, %v360_v8  ;;  %v334_v35 = vadd.f32 %v333_v20, %v332_v17  ;;  %v150_v10 = vunpack.c.h.bf16 %v4772_v22 }
  0x5a   :  { %v204_v38 = vld.sshfl [vmem:[#allocation1] sm:$0xff pattern:$0x75316420]  ;;  %v205_v39 = vld.sshfl [vmem:[#allocation1 + $0x8] sm:$0xff pattern:$0x75316420]  ;;  %v349_v43 = vadd.f32 %v348_v23, %v347_v18 }
  0x5b   :  { %215 = vst [vmem:[#allocation1] ss:$2 sm:$0xff] %v140_v36  ;;  %v363_v24 = vsel %vm299_vm0, %v204_v38, 0.0  ;;  %v378_v25 = vsel %vm299_vm0, %v205_v39, 0.0  ;;  %v127_v38 = vld [vmem:[#allocation3 + $0x5c] sm:$0xf]  ;;  %v149_v39 = vunpack.c.l.bf16 %v4772_v22 }
  0x5c   :  { %v379_v41 = vadd.f32 %v378_v25, %v377_v21  ;;  %v364_v46 = vadd.f32 %v363_v24, %v362_v29 }
  0x5e   :  { %v209_v50 = vld.sshfl [vmem:[#allocation1 + $0x10] sm:$0xff pattern:$0x75316420]  ;;  %v210_v51 = vld.sshfl [vmem:[#allocation1 + $0x18] sm:$0xff pattern:$0x75316420] }
  0x5f   :  { %216 = vst [vmem:[#allocation1 + $0x10] ss:$2 sm:$0xff] %v141_v42  ;;  %v211_v58 = vld.sshfl [vmem:[#allocation1 + $0x20] sm:$0xff pattern:$0x75316420]  ;;  %v305_v19 = vsel %vm299_vm0, %v209_v50, 0.0 }
  0x60   :  { %v212_v59 = vld.sshfl [vmem:[#allocation1 + $0x28] sm:$0xff pattern:$0x75316420]  ;;  %v213_v60 = vld.sshfl [vmem:[#allocation1 + $0x30] sm:$0xff pattern:$0x75316420]  ;;  %v306_v33 = vadd.f32 %v305_v19, %v304_v13 }
  0x61   :  { %v214_v61 = vld.sshfl [vmem:[#allocation1 + $0x38] sm:$0xff pattern:$0x75316420]  ;;  %217 = vst [vmem:[#allocation1 + $0x20] ss:$2 sm:$0xff] %v142_v48  ;;  %v320_v15 = vsel %vm299_vm0, %v210_v51, 0.0 }
  0x62   :  { %v218_v62 = vld.sshfl [vmem:[#allocation1] sm:$0xff pattern:$0x75316420]  ;;  %v219_v1 = vld.sshfl [vmem:[#allocation1 + $0x8] sm:$0xff pattern:$0x75316420]  ;;  %v321_v34 = vadd.f32 %v320_v15, %v319_v16 }
  0x63   :  { %224 = vst [vmem:[#allocation1 + $0x30] ss:$2 sm:$0xff] %v143_v49  ;;  %v335_v14 = vsel %vm299_vm0, %v211_v58, 0.0  ;;  %v307_v36 = vsel %vm299_vm0, %v218_v62, 0.0  ;;  %v322_v40 = vsel %vm299_vm0, %v219_v1, 0.0  ;;  %v350_v37 = vsel %vm299_vm0, %v212_v59, 0.0 }
  0x64   :  { %227 = vst [vmem:[#allocation1] ss:$2 sm:$0xff] %v144_v57  ;;  %v380_v44 = vsel %vm299_vm0, %v214_v61, 0.0  ;;  %v365_v47 = vsel %vm299_vm0, %v213_v60, 0.0  ;;  %v308_v50 = vadd.f32 %v307_v36, %v306_v33  ;;  %v323_v51 = vadd.f32 %v322_v40, %v321_v34 }
  0x65   :  { %v336_v54 = vadd.f32 %v335_v14, %v334_v35  ;;  %v381_v55 = vadd.f32 %v380_v44, %v379_v41  ;;  %v351_v57 = vadd.f32 %v350_v37, %v349_v43  ;;  %v151_v59 = vunpack.c.l.bf16 %v127_v38 }
  0x66   :  { %v220_v11 = vld.sshfl [vmem:[#allocation1 + $0x10] sm:$0xff pattern:$0x75316420]  ;;  %v221_v12 = vld.sshfl [vmem:[#allocation1 + $0x18] sm:$0xff pattern:$0x75316420]  ;;  %v366_v62 = vadd.f32 %v365_v47, %v364_v46 }
  0x67   :  { %228 = vst [vmem:[#allocation1 + $0x10] ss:$2 sm:$0xff] %v145_v3  ;;  %v337_v56 = vsel %vm299_vm0, %v220_v11, 0.0  ;;  %v352_v61 = vsel %vm299_vm0, %v221_v12, 0.0 }
  0x68   :  { %v222_v27 = vld.sshfl [vmem:[#allocation1 + $0x20] sm:$0xff pattern:$0x75316420]  ;;  %v223_v28 = vld.sshfl [vmem:[#allocation1 + $0x28] sm:$0xff pattern:$0x75316420]  ;;  %v338_v5 = vadd.f32 %v337_v56, %v336_v54  ;;  %v353_v9 = vadd.f32 %v352_v61, %v351_v57 }
  0x69   :  { %233 = vst [vmem:[#allocation1 + $0x20] ss:$2 sm:$0xff] %v146_v7  ;;  %v382_v58 = vsel %vm299_vm0, %v223_v28, 0.0  ;;  %v367_v2 = vsel %vm299_vm0, %v222_v27, 0.0  ;;  %v4350_v54 = vld [vmem:[#allocation5 + $0x3e4] sm:$0xf] }
  0x6a   :  { %v225_v31 = vld.sshfl [vmem:[#allocation1 + $0x30] sm:$0xff pattern:$0x75316420]  ;;  %v226_v32 = vld.sshfl [vmem:[#allocation1 + $0x38] sm:$0xff pattern:$0x75316420]  ;;  %v383_v6 = vadd.f32 %v382_v58, %v381_v55  ;;  %v368_v16 = vadd.f32 %v367_v2, %v366_v62 }
  0x6b   :  { %v229_v42 = vld.sshfl [vmem:[#allocation1] sm:$0xff pattern:$0x75316420]  ;;  %v230_v45 = vld.sshfl [vmem:[#allocation1 + $0x8] sm:$0xff pattern:$0x75316420] }
  0x6c   :  { %234 = vst [vmem:[#allocation1 + $0x30] ss:$2 sm:$0xff] %v147_v26  ;;  %v309_v52 = vsel %vm299_vm0, %v225_v31, 0.0  ;;  %v324_v53 = vsel %vm299_vm0, %v226_v32, 0.0  ;;  %v339_v60 = vsel %vm299_vm0, %v229_v42, 0.0  ;;  %v354_v13 = vsel %vm299_vm0, %v230_v45, 0.0 }
  0x6d   :  { %239 = vst [vmem:[#allocation1] ss:$2 sm:$0xff] %v148_v30  ;;  %v310_v63 = vadd.f32 %v309_v52, %v308_v50  ;;  %v325_v0 = vadd.f32 %v324_v53, %v323_v51  ;;  %v340_v14 = vadd.f32 %v339_v60, %v338_v5  ;;  %v355_v25 = vadd.f32 %v354_v13, %v353_v9  ;;  %v4318_v52 = vld [vmem:[#allocation5 + $0x2e4] sm:$0xf]  ;;  %v3350_v53 = vld [vmem:[#allocation5 + $0x2f0] sm:$0xf0] }
  0x6e   :  { %v231_v48 = vld.sshfl [vmem:[#allocation1 + $0x10] sm:$0xff pattern:$0x75316420]  ;;  %v232_v49 = vld.sshfl [vmem:[#allocation1 + $0x18] sm:$0xff pattern:$0x75316420] }
  0x6f   :  { %242 = vst [vmem:[#allocation1 + $0x10] ss:$2 sm:$0xff] %v149_v39  ;;  %v384_v3 = vsel %vm299_vm0, %v232_v49, 0.0  ;;  %v369_v15 = vsel %vm299_vm0, %v231_v48, 0.0  ;;  %v3478_v55 = vld [vmem:[#allocation5 + $0x3f0] sm:$0xf0] }
  0x70   :  { %v235_v1 = vld.sshfl [vmem:[#allocation1 + $0x20] sm:$0xff pattern:$0x75316420]  ;;  %v236_v4 = vld.sshfl [vmem:[#allocation1 + $0x28] sm:$0xff pattern:$0x75316420]  ;;  %v385_v23 = vadd.f32 %v384_v3, %v383_v6  ;;  %v370_v31 = vadd.f32 %v369_v15, %v368_v16 }
  0x71   :  { %v311_v11 = vsel %vm299_vm0, %v235_v1, 0.0  ;;  %v326_v12 = vsel %vm299_vm0, %v236_v4, 0.0  ;;  %243 = vst [vmem:[#allocation1 + $0x20] ss:$2 sm:$0xff] %v150_v10  ;;  %v4314_v58 = vld [vmem:[#allocation5 + $0x2c4] sm:$0xf] }
  0x72   :  { %v312_v18 = vadd.f32 %v311_v11, %v310_v63  ;;  %v327_v19 = vadd.f32 %v326_v12, %v325_v0  ;;  %v3353_v63 = vor.u32 %v4318_v52, %v3350_v53  ;;  %v3481_v0 = vor.u32 %v4350_v54, %v3478_v55  ;;  %v4346_v4 = vld [vmem:[#allocation5 + $0x3c4] sm:$0xf]  ;;  %v3462_v5 = vld [vmem:[#allocation5 + $0x3d0] sm:$0xf0] }
  0x73   :  { %v237_v7 = vld.sshfl [vmem:[#allocation1 + $0x30] sm:$0xff pattern:$0x75316420]  ;;  %v238_v8 = vld.sshfl [vmem:[#allocation1 + $0x38] sm:$0xff pattern:$0x75316420]  ;;  %v3465_v9 = vor.u32 %v4346_v4, %v3462_v5 }
  0x74   :  { %244 = vst [vmem:[#allocation1 + $0x30] ss:$2 sm:$0xff] %v151_v59  ;;  %v241_v17 = vld.sshfl [vmem:[#allocation1 + $0x8] sm:$0xff pattern:$0x75316420]  ;;  %v341_v30 = vsel %vm299_vm0, %v237_v7, 0.0 }
  0x75   :  { %v386_v26 = vsel %vm299_vm0, %v241_v17, 0.0  ;;  %v240_v27 = vld.sshfl [vmem:[#allocation1] sm:$0xff pattern:$0x75316420]  ;;  %v356_v32 = vsel %vm299_vm0, %v238_v8, 0.0  ;;  %v342_v37 = vadd.f32 %v341_v30, %v340_v14 }
  0x76   :  { %v245_v20 = vld.sshfl [vmem:[#allocation1 + $0x10] sm:$0xff pattern:$0x75316420]  ;;  %v246_v21 = vld.sshfl [vmem:[#allocation1 + $0x18] sm:$0xff pattern:$0x75316420]  ;;  %v387_v34 = vadd.f32 %v386_v26, %v385_v23  ;;  %v357_v41 = vadd.f32 %v356_v32, %v355_v25 }
  0x77   :  { %v313_v24 = vsel %vm299_vm0, %v245_v20, 0.0  ;;  %v328_v22 = vsel %vm299_vm0, %v246_v21, 0.0  ;;  %v371_v33 = vsel %vm299_vm0, %v240_v27, 0.0  ;;  %v3334_v59 = vld [vmem:[#allocation5 + $0x2d0] sm:$0xf0] }
  0x78   :  { %v314_v28 = vadd.f32 %v313_v24, %v312_v18  ;;  %v329_v29 = vadd.f32 %v328_v22, %v327_v19  ;;  %v372_v38 = vadd.f32 %v371_v33, %v370_v31  ;;  %v247_v45 = vld.sshfl [vmem:[#allocation1 + $0x20] sm:$0xff pattern:$0x75316420]  ;;  %v248_v46 = vld.sshfl [vmem:[#allocation1 + $0x28] sm:$0xff pattern:$0x75316420]  ;;  %v3337_v8 = vor.u32 %v4314_v58, %v3334_v59 }
  0x79   :  { %v343_v47 = vsel %vm299_vm0, %v247_v45, 0.0  ;;  %v358_v48 = vsel %vm299_vm0, %v248_v46, 0.0  ;;  %v4382_v6 = vld [vmem:[#allocation5 + $0x4e4] sm:$0xf]  ;;  %v3606_v7 = vld [vmem:[#allocation5 + $0x4f0] sm:$0xf0] }
  0x7a   :  { %v396_v35 = vrot.slane %v329_v29, 4  ;;  %v344_v50 = vadd.f32 %v343_v47, %v342_v37  ;;  %v359_v51 = vadd.f32 %v358_v48, %v357_v41  ;;  %v4414_v10 = vld [vmem:[#allocation5 + $0x5e4] sm:$0xf]  ;;  %v3734_v11 = vld [vmem:[#allocation5 + $0x5f0] sm:$0xf0]  ;;  %v3609_v21 = vor.u32 %v4382_v6, %v3606_v7 }
  0x7b   :  { %v249_v36 = vld.sshfl [vmem:[#allocation1 + $0x30] sm:$0xff pattern:$0x75316420]  ;;  %v250_v40 = vld.sshfl [vmem:[#allocation1 + $0x38] sm:$0xff pattern:$0x75316420]  ;;  %v3737_v14 = vor.u32 %v4414_v10, %v3734_v11 }
  0x7c   :  { %v388_v39 = vsel %vm299_vm0, %v250_v40, 0.0  ;;  %v399_v42 = vsel %vm299_vm0, %v314_v28, %v396_v35  ;;  %v373_v43 = vsel %vm299_vm0, %v249_v36, 0.0  ;;  %v397_v56 = vrot.slane %v359_v51, 4  ;;  %v4310_v12 = vld [vmem:[#allocation5 + $0x2a4] sm:$0xf] }
  0x7d   :  { %420 = vst [vmem:[#allocation1] ss:$2 sm:$0xff] %v399_v42  ;;  %v389_v44 = vadd.f32 %v388_v39, %v387_v34  ;;  %v374_v49 = vadd.f32 %v373_v43, %v372_v38  ;;  %v3318_v13 = vld [vmem:[#allocation5 + $0x2b0] sm:$0xf0]  ;;  %v4342_v16 = vld [vmem:[#allocation5 + $0x3a4] sm:$0xf] }
  0x7e   :  { %v400_v62 = vsel %vm299_vm0, %v344_v50, %v397_v56  ;;  %v3446_v17 = vld [vmem:[#allocation5 + $0x3b0] sm:$0xf0]  ;;  %v4378_v18 = vld [vmem:[#allocation5 + $0x4c4] sm:$0xf]  ;;  %v3321_v26 = vor.u32 %v4310_v12, %v3318_v13 }
  0x7f   :  { %v398_v57 = vrot.slane %v389_v44, 4  ;;  %422 = vst [vmem:[#allocation1 + $0x10] ss:$2 sm:$0xff] %v400_v62  ;;  %v3590_v19 = vld [vmem:[#allocation5 + $0x4d0] sm:$0xf0]  ;;  %v3449_v27 = vor.u32 %v4342_v16, %v3446_v17 }
  0x80   :  { %v4410_v22 = vld [vmem:[#allocation5 + $0x5c4] sm:$0xf]  ;;  %v3718_v25 = vld [vmem:[#allocation5 + $0x5d0] sm:$0xf0]  ;;  %v3593_v34 = vor.u32 %v4378_v18, %v3590_v19 }
  0x81   :  { %v401_v2 = vsel %vm299_vm0, %v374_v49, %v398_v57  ;;  %v4306_v28 = vld [vmem:[#allocation5 + $0x284] sm:$0xf]  ;;  %v3302_v29 = vld [vmem:[#allocation5 + $0x290] sm:$0xf0]  ;;  %v3721_v35 = vor.u32 %v4410_v22, %v3718_v25  ;;  %v3100_v22 = vld [vmem:[#allocation5 + $0xe8] sm:$0xf] }
  0x82   :  { %424 = vst [vmem:[#allocation1 + $0x20] ss:$2 sm:$0xff] %v401_v2  ;;  %v4338_v30 = vld [vmem:[#allocation5 + $0x384] sm:$0xf]  ;;  %v3430_v31 = vld [vmem:[#allocation5 + $0x390] sm:$0xf0]  ;;  %v3305_v38 = vor.u32 %v4306_v28, %v3302_v29 }
  0x83   :  { %v4374_v32 = vld [vmem:[#allocation5 + $0x4a4] sm:$0xf]  ;;  %v3574_v33 = vld [vmem:[#allocation5 + $0x4b0] sm:$0xf0]  ;;  %v3433_v39 = vor.u32 %v4338_v30, %v3430_v31  ;;  %v4257_v25 = vld [vmem:[#allocation5 + $0xf4] sm:$0xf0] }
  0x84   :  { %v425_v60 = vld.sshfl [vmem:[#allocation1] sm:$0xff pattern:$0x75316420]  ;;  %v426_v61 = vld.sshfl [vmem:[#allocation1 + $0x8] sm:$0xff pattern:$0x75316420]  ;;  %v3577_v48 = vor.u32 %v4374_v32, %v3574_v33 }
  0x85   :  { %v4810_v3 = vpack.c.bf16 %v425_v60, %v425_v60  ;;  %v4812_v1 = vpack.c.bf16 %v426_v61, %v426_v61  ;;  %v4406_v37 = vld [vmem:[#allocation5 + $0x5a4] sm:$0xf]  ;;  %v3702_v41 = vld [vmem:[#allocation5 + $0x5b0] sm:$0xf0] }
  0x86   :  { %v427_v15 = vld.sshfl [vmem:[#allocation1 + $0x10] sm:$0xff pattern:$0x75316420]  ;;  %v428_v20 = vld.sshfl [vmem:[#allocation1 + $0x18] sm:$0xff pattern:$0x75316420]  ;;  %v3705_v49 = vor.u32 %v4406_v37, %v3702_v41 }
  0x87   :  { %1613 = vmatmul.bf16.vlgmr.msra.gmra.mxu0 %v4810_v3  ;;  %1626 = vmatmul.bf16.vlgmr.msra.gmra.mxu1 %v4812_v1  ;;  %v4816_v23 = vpack.c.bf16 %v427_v15, %v427_v15  ;;  %v4818_v24 = vpack.c.bf16 %v428_v20, %v428_v20  ;;  %v4302_v42 = vld [vmem:[#allocation5 + $0x264] sm:$0xf]  ;;  %v3286_v43 = vld [vmem:[#allocation5 + $0x270] sm:$0xf0]  ;;  %v3084_v37 = vld [vmem:[#allocation5 + $0xc8] sm:$0xf] }
  0x88   :  { %1709 = vmatpush.bf16.msra.mxu0 %v3353_v63  ;;  %1722 = vmatpush.bf16.msra.mxu1 %v3481_v0  ;;  %v4334_v44 = vld [vmem:[#allocation5 + $0x364] sm:$0xf]  ;;  %v3414_v45 = vld [vmem:[#allocation5 + $0x370] sm:$0xf0]  ;;  %v3289_v54 = vor.u32 %v4302_v42, %v3286_v43  ;;  %v4253_v41 = vld [vmem:[#allocation5 + $0xd4] sm:$0xf0] }
  0x89   :  { %1639 = vmatmul.bf16.vlgmr.msra.gmra.mxu2 %v4816_v23  ;;  %1652 = vmatmul.bf16.vlgmr.msra.gmra.mxu3 %v4818_v24  ;;  %v429_v36 = vld.sshfl [vmem:[#allocation1 + $0x20] sm:$0xff pattern:$0x75316420]  ;;  %v430_v40 = vld.sshfl [vmem:[#allocation1 + $0x28] sm:$0xff pattern:$0x75316420]  ;;  %v3417_v55 = vor.u32 %v4334_v44, %v3414_v45 }
  0x8a   :  { %1735 = vmatpush.bf16.msra.mxu2 %v3609_v21  ;;  %1748 = vmatpush.bf16.msra.mxu3 %v3737_v14  ;;  %v4822_v46 = vpack.c.bf16 %v429_v36, %v429_v36  ;;  %v4824_v47 = vpack.c.bf16 %v430_v40, %v430_v40  ;;  %v4370_v50 = vld [vmem:[#allocation5 + $0x484] sm:$0xf]  ;;  %v3558_v51 = vld [vmem:[#allocation5 + $0x490] sm:$0xf0]  ;;  %v3101_v36 = vor.u32 %v4257_v25, %v3100_v22  ;;  %v3164_v22 = vld [vmem:[#allocation5 + $0x168] sm:$0xf] }
  0x8b   :  { %v4402_v52 = vld [vmem:[#allocation5 + $0x584] sm:$0xf]  ;;  %v3686_v53 = vld [vmem:[#allocation5 + $0x590] sm:$0xf0]  ;;  %v3561_v60 = vor.u32 %v4370_v50, %v3558_v51  ;;  %v3356_v50 = vld [vmem:[#allocation5 + $0x2e8] sm:$0xf] }
  0x8c   :  { %1710 = vmatpush.bf16.msra.mxu0 %v3337_v8  ;;  %1723 = vmatpush.bf16.msra.mxu1 %v3465_v9  ;;  %v4298_v56 = vld [vmem:[#allocation5 + $0x244] sm:$0xf]  ;;  %v3270_v57 = vld [vmem:[#allocation5 + $0x250] sm:$0xf0]  ;;  %v3689_v61 = vor.u32 %v4402_v52, %v3686_v53  ;;  %v4321_v51 = vld [vmem:[#allocation5 + $0x2f4] sm:$0xf0] }
  0x8d   :  { %v4330_v58 = vld [vmem:[#allocation5 + $0x344] sm:$0xf]  ;;  %v3398_v59 = vld [vmem:[#allocation5 + $0x350] sm:$0xf0]  ;;  %v3273_v4 = vor.u32 %v4298_v56, %v3270_v57  ;;  %v3484_v52 = vld [vmem:[#allocation5 + $0x3e8] sm:$0xf] }
  0x8e   :  { %1736 = vmatpush.bf16.msra.mxu2 %v3593_v34  ;;  %1749 = vmatpush.bf16.msra.mxu3 %v3721_v35  ;;  %v4366_v62 = vld [vmem:[#allocation5 + $0x464] sm:$0xf]  ;;  %v3542_v63 = vld [vmem:[#allocation5 + $0x470] sm:$0xf0]  ;;  %v3401_v5 = vor.u32 %v4330_v58, %v3398_v59  ;;  %v4353_v53 = vld [vmem:[#allocation5 + $0x3f4] sm:$0xf0] }
  0x8f   :  { %v4398_v0 = vld [vmem:[#allocation5 + $0x564] sm:$0xf]  ;;  %v3670_v2 = vld [vmem:[#allocation5 + $0x570] sm:$0xf0]  ;;  %v3545_v10 = vor.u32 %v4366_v62, %v3542_v63  ;;  %v3068_v56 = vld [vmem:[#allocation5 + $0xa8] sm:$0xf]  ;;  %v3357_v62 = vor.u32 %v4321_v51, %v3356_v50  ;;  %v3485_v63 = vor.u32 %v4353_v53, %v3484_v52 }
  0x90   :  { %1711 = vmatpush.bf16.msra.mxu0 %v3321_v26  ;;  %1724 = vmatpush.bf16.msra.mxu1 %v3449_v27  ;;  %v4294_v6 = vld [vmem:[#allocation5 + $0x224] sm:$0xf]  ;;  %v3254_v7 = vld [vmem:[#allocation5 + $0x230] sm:$0xf0]  ;;  %v3673_v11 = vor.u32 %v4398_v0, %v3670_v2  ;;  %v3228_v26 = vld [vmem:[#allocation5 + $0x1e8] sm:$0xf] }
  0x91   :  { %v4326_v8 = vld [vmem:[#allocation5 + $0x324] sm:$0xf]  ;;  %v3382_v9 = vld [vmem:[#allocation5 + $0x330] sm:$0xf0]  ;;  %v3257_v18 = vor.u32 %v4294_v6, %v3254_v7  ;;  %v4289_v27 = vld [vmem:[#allocation5 + $0x1f4] sm:$0xf0] }
  0x92   :  { %1737 = vmatpush.bf16.msra.mxu2 %v3577_v48  ;;  %1750 = vmatpush.bf16.msra.mxu3 %v3705_v49  ;;  %v4362_v12 = vld [vmem:[#allocation5 + $0x444] sm:$0xf]  ;;  %v3526_v13 = vld [vmem:[#allocation5 + $0x450] sm:$0xf0]  ;;  %v3385_v19 = vor.u32 %v4326_v8, %v3382_v9  ;;  %v3229_v40 = vor.u32 %v4289_v27, %v3228_v26  ;;  %v4249_v57 = vld [vmem:[#allocation5 + $0xb4] sm:$0xf0] }
  0x93   :  { %v4394_v16 = vld [vmem:[#allocation5 + $0x544] sm:$0xf]  ;;  %v3654_v17 = vld [vmem:[#allocation5 + $0x550] sm:$0xf0]  ;;  %v3529_v28 = vor.u32 %v4362_v12, %v3526_v13  ;;  %v3196_v58 = vld [vmem:[#allocation5 + $0x1a8] sm:$0xf]  ;;  %v3069_v6 = vor.u32 %v4249_v57, %v3068_v56 }
  0x94   :  { %1712 = vmatpush.bf16.msra.mxu0 %v3305_v38  ;;  %1725 = vmatpush.bf16.msra.mxu1 %v3433_v39  ;;  %v4290_v15 = vld [vmem:[#allocation5 + $0x204] sm:$0xf]  ;;  %v3238_v20 = vld [vmem:[#allocation5 + $0x210] sm:$0xf0]  ;;  %v3657_v29 = vor.u32 %v4394_v16, %v3654_v17  ;;  %v3212_v38 = vld [vmem:[#allocation5 + $0x1c8] sm:$0xf] }
  0x95   :  { %v4322_v21 = vld [vmem:[#allocation5 + $0x304] sm:$0xf]  ;;  %v3366_v14 = vld [vmem:[#allocation5 + $0x310] sm:$0xf0]  ;;  %v3241_v34 = vor.u32 %v4290_v15, %v3238_v20  ;;  %v4285_v39 = vld [vmem:[#allocation5 + $0x1d4] sm:$0xf0] }
  0x96   :  { %1738 = vmatpush.bf16.msra.mxu2 %v3561_v60  ;;  %1751 = vmatpush.bf16.msra.mxu3 %v3689_v61  ;;  %v4358_v30 = vld [vmem:[#allocation5 + $0x424] sm:$0xf]  ;;  %v3510_v31 = vld [vmem:[#allocation5 + $0x430] sm:$0xf0]  ;;  %v3369_v35 = vor.u32 %v4322_v21, %v3366_v14  ;;  %v4281_v59 = vld [vmem:[#allocation5 + $0x1b4] sm:$0xf0] }
  0x97   :  { %1665 = vmatmul.bf16.vlgmr.msrb.gmra.mxu0 %v4822_v46  ;;  %1678 = vmatmul.bf16.vlgmr.msrb.gmra.mxu1 %v4824_v47  ;;  %v4390_v32 = vld [vmem:[#allocation5 + $0x524] sm:$0xf]  ;;  %v3638_v33 = vld [vmem:[#allocation5 + $0x530] sm:$0xf0]  ;;  %v3513_v42 = vor.u32 %v4358_v30, %v3510_v31  ;;  %v3340_v0 = vld [vmem:[#allocation5 + $0x2c8] sm:$0xf]  ;;  %v3197_v7 = vor.u32 %v4281_v59, %v3196_v58 }
  0x98   :  { %1713 = vmatpush.bf16.msra.mxu0 %v3289_v54  ;;  %1726 = vmatpush.bf16.msra.mxu1 %v3417_v55  ;;  %v3641_v43 = vor.u32 %v4390_v32, %v3638_v33  ;;  %v4354_v44 = vld [vmem:[#allocation5 + $0x404] sm:$0xf]  ;;  %v3494_v45 = vld [vmem:[#allocation5 + $0x410] sm:$0xf0]  ;;  %v3085_v54 = vor.u32 %v4253_v41, %v3084_v37  ;;  %v3213_v55 = vor.u32 %v4285_v39, %v3212_v38  ;;  %v4317_v2 = vld [vmem:[#allocation5 + $0x2d4] sm:$0xf0] }
  0x99   :  { %1691 = vmatmul.bf16.vlgmr.msrb.gmra.mxu2 %v4810_v3  ;;  %1704 = vmatmul.bf16.vlgmr.msrb.gmra.mxu3 %v4812_v1  ;;  %v4386_v48 = vld [vmem:[#allocation5 + $0x504] sm:$0xf]  ;;  %v3622_v49 = vld [vmem:[#allocation5 + $0x510] sm:$0xf0]  ;;  %v3497_v60 = vor.u32 %v4354_v44, %v3494_v45  ;;  %v3052_v8 = vld [vmem:[#allocation5 + $0x88] sm:$0xf]  ;;  %v3341_v12 = vor.u32 %v4317_v2, %v3340_v0 }
  0x9a   :  { %1739 = vmatpush.bf16.msra.mxu2 %v3545_v10  ;;  %1752 = vmatpush.bf16.msra.mxu3 %v3673_v11  ;;  %v3625_v61 = vor.u32 %v4386_v48, %v3622_v49  ;;  %v4245_v9 = vld [vmem:[#allocation5 + $0x94] sm:$0xf0]  ;;  %v3180_v10 = vld [vmem:[#allocation5 + $0x188] sm:$0xf] }
  0x9b   :  { %v4277_v11 = vld [vmem:[#allocation5 + $0x194] sm:$0xf0]  ;;  %v3324_v16 = vld [vmem:[#allocation5 + $0x2a8] sm:$0xf]  ;;  %v3053_v15 = vor.u32 %v4245_v9, %v3052_v8 }
  0x9c   :  { %1714 = vmatpush.bf16.msra.mxu0 %v3273_v4  ;;  %1727 = vmatpush.bf16.msra.mxu1 %v3401_v5  ;;  %v3468_v4 = vld [vmem:[#allocation5 + $0x3c8] sm:$0xf]  ;;  %v4349_v5 = vld [vmem:[#allocation5 + $0x3d4] sm:$0xf0]  ;;  %v3181_v20 = vor.u32 %v4277_v11, %v3180_v10 }
  0x9d   :  { %v3469_v13 = vor.u32 %v4349_v5, %v3468_v4  ;;  %v4313_v17 = vld [vmem:[#allocation5 + $0x2b4] sm:$0xf0]  ;;  %v3036_v21 = vld [vmem:[#allocation5 + $0x68] sm:$0xf] }
  0x9e   :  { %1740 = vmatpush.bf16.msra.mxu2 %v3529_v28  ;;  %1753 = vmatpush.bf16.msra.mxu3 %v3657_v29  ;;  %v4241_v14 = vld [vmem:[#allocation5 + $0x74] sm:$0xf0]  ;;  %v3325_v26 = vor.u32 %v4313_v17, %v3324_v16  ;;  %v3308_v28 = vld [vmem:[#allocation5 + $0x288] sm:$0xf] }
  0x9f   :  { %v4273_v25 = vld [vmem:[#allocation5 + $0x174] sm:$0xf0]  ;;  %v3436_v30 = vld [vmem:[#allocation5 + $0x388] sm:$0xf]  ;;  %v3037_v32 = vor.u32 %v4241_v14, %v3036_v21 }
  0xa0   :  { %1715 = vmatpush.bf16.msra.mxu0 %v3257_v18  ;;  %1728 = vmatpush.bf16.msra.mxu1 %v3385_v19  ;;  %v3452_v18 = vld [vmem:[#allocation5 + $0x3a8] sm:$0xf]  ;;  %v4345_v19 = vld [vmem:[#allocation5 + $0x3b4] sm:$0xf0]  ;;  %v3165_v33 = vor.u32 %v4273_v25, %v3164_v22 }
  0xa1   :  { %v3453_v27 = vor.u32 %v4345_v19, %v3452_v18  ;;  %v4309_v29 = vld [vmem:[#allocation5 + $0x294] sm:$0xf0]  ;;  %v3292_v38 = vld [vmem:[#allocation5 + $0x268] sm:$0xf] }
  0xa2   :  { %1741 = vmatpush.bf16.msra.mxu2 %v3513_v42  ;;  %1754 = vmatpush.bf16.msra.mxu3 %v3641_v43  ;;  %v4341_v31 = vld [vmem:[#allocation5 + $0x394] sm:$0xf0]  ;;  %v3309_v37 = vor.u32 %v4309_v29, %v3308_v28  ;;  %v3420_v42 = vld [vmem:[#allocation5 + $0x368] sm:$0xf]  ;;  %v4255_v28 = vld [vmem:[#allocation5 + $0xec] sm:$0xf] }
  0xa3   :  { %v3437_v41 = vor.u32 %v4341_v31, %v3436_v30  ;;  %v4305_v39 = vld [vmem:[#allocation5 + $0x274] sm:$0xf0]  ;;  %v3004_v48 = vld [vmem:[#allocation5 + $0x28] sm:$0xf]  ;;  %v3102_v29 = vld [vmem:[#allocation5 + $0xf8] sm:$0xf0] }
  0xa4   :  { %1716 = vmatpush.bf16.msra.mxu0 %v3241_v34  ;;  %1729 = vmatpush.bf16.msra.mxu1 %v3369_v35  ;;  %v3020_v34 = vld [vmem:[#allocation5 + $0x48] sm:$0xf]  ;;  %v4237_v35 = vld [vmem:[#allocation5 + $0x54] sm:$0xf0]  ;;  %v3293_v52 = vor.u32 %v4305_v39, %v3292_v38  ;;  %v4287_v30 = vld [vmem:[#allocation5 + $0x1ec] sm:$0xf]  ;;  %v3105_v38 = vor.u32 %v4255_v28, %v3102_v29 }
  0xa5   :  { %v4337_v43 = vld [vmem:[#allocation5 + $0x374] sm:$0xf0]  ;;  %v3021_v44 = vor.u32 %v4237_v35, %v3020_v34  ;;  %v3132_v50 = vld [vmem:[#allocation5 + $0x128] sm:$0xf]  ;;  %v3230_v31 = vld [vmem:[#allocation5 + $0x1f8] sm:$0xf0] }
  0xa6   :  { %1742 = vmatpush.bf16.msra.mxu2 %v3497_v60  ;;  %1755 = vmatpush.bf16.msra.mxu3 %v3625_v61  ;;  %v4233_v49 = vld [vmem:[#allocation5 + $0x34] sm:$0xf0]  ;;  %v3421_v53 = vor.u32 %v4337_v43, %v3420_v42  ;;  %v3404_v56 = vld [vmem:[#allocation5 + $0x348] sm:$0xf]  ;;  %v3233_v39 = vor.u32 %v4287_v30, %v3230_v31  ;;  %v4251_v42 = vld [vmem:[#allocation5 + $0xcc] sm:$0xf] }
  0xa7   :  { %1717 = vmatmul.bf16.vlgmr.msra.gmra.mxu0 %v4816_v23  ;;  %1730 = vmatmul.bf16.vlgmr.msra.gmra.mxu1 %v4818_v24  ;;  %v4265_v51 = vld [vmem:[#allocation5 + $0x134] sm:$0xf0]  ;;  %v3005_v58 = vor.u32 %v4233_v49, %v3004_v48  ;;  %v2988_v60 = vld [vmem:[#allocation5 + $0x8] sm:$0xf]  ;;  %v3086_v43 = vld [vmem:[#allocation5 + $0xd8] sm:$0xf0] }
  0xa8   :  { %1761 = vmatpush.bf16.msrb.mxu0 %v3101_v36  ;;  %1774 = vmatpush.bf16.msrb.mxu1 %v3229_v40  ;;  %v3148_v36 = vld [vmem:[#allocation5 + $0x148] sm:$0xf]  ;;  %v4269_v40 = vld [vmem:[#allocation5 + $0x154] sm:$0xf0]  ;;  %v3133_v59 = vor.u32 %v4265_v51, %v3132_v50 }
  0xa9   :  { %1743 = vmatmul.bf16.vlgmr.msra.gmra.mxu2 %v4822_v46  ;;  %1756 = vmatmul.bf16.vlgmr.msra.gmra.mxu3 %v4824_v47  ;;  %v3149_v45 = vor.u32 %v4269_v40, %v3148_v36  ;;  %v4333_v57 = vld [vmem:[#allocation5 + $0x354] sm:$0xf0]  ;;  %v3612_v0 = vld [vmem:[#allocation5 + $0x4e8] sm:$0xf] }
  0xaa   :  { %1787 = vmatpush.bf16.msrb.mxu2 %v3357_v62  ;;  %1800 = vmatpush.bf16.msrb.mxu3 %v3485_v63  ;;  %v4229_v61 = vld [vmem:[#allocation5 + $0x14] sm:$0xf0]  ;;  %v3116_v62 = vld [vmem:[#allocation5 + $0x108] sm:$0xf] }
  0xab   :  { %v4261_v63 = vld [vmem:[#allocation5 + $0x114] sm:$0xf0]  ;;  %v3740_v4 = vld [vmem:[#allocation5 + $0x5e8] sm:$0xf] }
  0xac   :  { %1762 = vmatpush.bf16.msrb.mxu0 %v3085_v54  ;;  %1775 = vmatpush.bf16.msrb.mxu1 %v3213_v55  ;;  %v3276_v54 = vld [vmem:[#allocation5 + $0x248] sm:$0xf]  ;;  %v4301_v55 = vld [vmem:[#allocation5 + $0x254] sm:$0xf0] }
  0xad   :  { %v4385_v2 = vld [vmem:[#allocation5 + $0x4f4] sm:$0xf0]  ;;  %v3260_v8 = vld [vmem:[#allocation5 + $0x228] sm:$0xf] }
  0xae   :  { %1788 = vmatpush.bf16.msrb.mxu2 %v3341_v12  ;;  %1801 = vmatpush.bf16.msrb.mxu3 %v3469_v13  ;;  %v4417_v5 = vld [vmem:[#allocation5 + $0x5f4] sm:$0xf0]  ;;  %v3388_v10 = vld [vmem:[#allocation5 + $0x328] sm:$0xf]  ;;  %v2989_v12 = vor.u32 %v4229_v61, %v2988_v60  ;;  %v3117_v13 = vor.u32 %v4261_v63, %v3116_v62  ;;  %v3613_v16 = vor.u32 %v4385_v2, %v3612_v0 }
  0xaf   :  { %v4297_v9 = vld [vmem:[#allocation5 + $0x234] sm:$0xf0]  ;;  %v3741_v17 = vor.u32 %v4417_v5, %v3740_v4  ;;  %v3596_v18 = vld [vmem:[#allocation5 + $0x4c8] sm:$0xf] }
  0xb0   :  { %1763 = vmatpush.bf16.msrb.mxu0 %v3069_v6  ;;  %1776 = vmatpush.bf16.msrb.mxu1 %v3197_v7  ;;  %v3277_v6 = vor.u32 %v4301_v55, %v3276_v54  ;;  %v3405_v7 = vor.u32 %v4333_v57, %v3404_v56  ;;  %v4329_v11 = vld [vmem:[#allocation5 + $0x334] sm:$0xf0]  ;;  %v3261_v21 = vor.u32 %v4297_v9, %v3260_v8  ;;  %v3244_v22 = vld [vmem:[#allocation5 + $0x208] sm:$0xf]  ;;  %v4247_v56 = vld [vmem:[#allocation5 + $0xac] sm:$0xf] }
  0xb1   :  { %v4381_v19 = vld [vmem:[#allocation5 + $0x4d4] sm:$0xf0]  ;;  %v3389_v14 = vor.u32 %v4329_v11, %v3388_v10  ;;  %v3580_v34 = vld [vmem:[#allocation5 + $0x4a8] sm:$0xf]  ;;  %v3089_v54 = vor.u32 %v4251_v42, %v3086_v43  ;;  %v3070_v57 = vld [vmem:[#allocation5 + $0xb8] sm:$0xf0] }
  0xb2   :  { %1789 = vmatpush.bf16.msrb.mxu2 %v3325_v26  ;;  %1802 = vmatpush.bf16.msrb.mxu3 %v3453_v27  ;;  %v4293_v25 = vld [vmem:[#allocation5 + $0x214] sm:$0xf0]  ;;  %v3372_v26 = vld [vmem:[#allocation5 + $0x308] sm:$0xf]  ;;  %v3073_v4 = vor.u32 %v4247_v56, %v3070_v57  ;;  %v4275_v8 = vld [vmem:[#allocation5 + $0x18c] sm:$0xf] }
  0xb3   :  { %v4325_v27 = vld [vmem:[#allocation5 + $0x314] sm:$0xf0]  ;;  %v3708_v36 = vld [vmem:[#allocation5 + $0x5a8] sm:$0xf]  ;;  %v3182_v9 = vld [vmem:[#allocation5 + $0x198] sm:$0xf0] }
  0xb4   :  { %1764 = vmatpush.bf16.msrb.mxu0 %v3053_v15  ;;  %1777 = vmatpush.bf16.msrb.mxu1 %v3181_v20  ;;  %v3724_v15 = vld [vmem:[#allocation5 + $0x5c8] sm:$0xf]  ;;  %v4413_v20 = vld [vmem:[#allocation5 + $0x5d4] sm:$0xf0]  ;;  %v4319_v42 = vld [vmem:[#allocation5 + $0x2ec] sm:$0xf] }
  0xb5   :  { %v4377_v35 = vld [vmem:[#allocation5 + $0x4b4] sm:$0xf0]  ;;  %v3564_v50 = vld [vmem:[#allocation5 + $0x488] sm:$0xf]  ;;  %v3358_v43 = vld [vmem:[#allocation5 + $0x2f8] sm:$0xf0] }
  0xb6   :  { %1790 = vmatpush.bf16.msrb.mxu2 %v3309_v37  ;;  %1803 = vmatpush.bf16.msrb.mxu3 %v3437_v41  ;;  %v4409_v40 = vld [vmem:[#allocation5 + $0x5b4] sm:$0xf0]  ;;  %v3245_v37 = vor.u32 %v4293_v25, %v3244_v22  ;;  %v3373_v41 = vor.u32 %v4325_v27, %v3372_v26  ;;  %v3581_v48 = vor.u32 %v4377_v35, %v3580_v34  ;;  %v3548_v62 = vld [vmem:[#allocation5 + $0x468] sm:$0xf]  ;;  %v4267_v34 = vld [vmem:[#allocation5 + $0x14c] sm:$0xf] }
  0xb7   :  { %v3709_v49 = vor.u32 %v4409_v40, %v3708_v36  ;;  %v4373_v51 = vld [vmem:[#allocation5 + $0x494] sm:$0xf0]  ;;  %v3676_v0 = vld [vmem:[#allocation5 + $0x568] sm:$0xf]  ;;  %v3150_v35 = vld [vmem:[#allocation5 + $0x158] sm:$0xf0]  ;;  %v3361_v56 = vor.u32 %v4319_v42, %v3358_v43 }
  0xb8   :  { %1765 = vmatpush.bf16.msrb.mxu0 %v3037_v32  ;;  %1778 = vmatpush.bf16.msrb.mxu1 %v3165_v33  ;;  %v3597_v32 = vor.u32 %v4381_v19, %v3596_v18  ;;  %v3725_v33 = vor.u32 %v4413_v20, %v3724_v15  ;;  %v3565_v60 = vor.u32 %v4373_v51, %v3564_v50  ;;  %v4369_v63 = vld [vmem:[#allocation5 + $0x474] sm:$0xf0]  ;;  %v4239_v15 = vld [vmem:[#allocation5 + $0x6c] sm:$0xf]  ;;  %v3038_v20 = vld [vmem:[#allocation5 + $0x78] sm:$0xf0] }
  0xb9   :  { %v4401_v2 = vld [vmem:[#allocation5 + $0x574] sm:$0xf0]  ;;  %v3549_v10 = vor.u32 %v4369_v63, %v3548_v62  ;;  %v3185_v19 = vor.u32 %v4275_v8, %v3182_v9  ;;  %v3516_v26 = vld [vmem:[#allocation5 + $0x428] sm:$0xf]  ;;  %v3041_v30 = vor.u32 %v4239_v15, %v3038_v20  ;;  %v4231_v50 = vld [vmem:[#allocation5 + $0x2c] sm:$0xf] }
  0xba   :  { %1791 = vmatpush.bf16.msrb.mxu2 %v3293_v52  ;;  %1804 = vmatpush.bf16.msrb.mxu3 %v3421_v53  ;;  %v3692_v52 = vld [vmem:[#allocation5 + $0x588] sm:$0xf]  ;;  %v4405_v53 = vld [vmem:[#allocation5 + $0x594] sm:$0xf0]  ;;  %v3677_v11 = vor.u32 %v4401_v2, %v3676_v0  ;;  %v3006_v51 = vld [vmem:[#allocation5 + $0x38] sm:$0xf0] }
  0xbb   :  { %v3693_v61 = vor.u32 %v4405_v53, %v3692_v52  ;;  %v4361_v27 = vld [vmem:[#allocation5 + $0x434] sm:$0xf0]  ;;  %v3644_v28 = vld [vmem:[#allocation5 + $0x528] sm:$0xf]  ;;  %v4263_v52 = vld [vmem:[#allocation5 + $0x12c] sm:$0xf]  ;;  %v3009_v62 = vor.u32 %v4231_v50, %v3006_v51 }
  0xbc   :  { %1766 = vmatpush.bf16.msrb.mxu0 %v3021_v44  ;;  %1779 = vmatpush.bf16.msrb.mxu1 %v3149_v45  ;;  %v4283_v44 = vld [vmem:[#allocation5 + $0x1cc] sm:$0xf]  ;;  %v3214_v45 = vld [vmem:[#allocation5 + $0x1d8] sm:$0xf0]  ;;  %v4393_v29 = vld [vmem:[#allocation5 + $0x534] sm:$0xf0]  ;;  %v3517_v36 = vor.u32 %v4361_v27, %v3516_v26 }
  0xbd   :  { %v3217_v55 = vor.u32 %v4283_v44, %v3214_v45  ;;  %v3645_v40 = vor.u32 %v4393_v29, %v3644_v28  ;;  %v4351_v44 = vld [vmem:[#allocation5 + $0x3ec] sm:$0xf]  ;;  %v3486_v45 = vld [vmem:[#allocation5 + $0x3f8] sm:$0xf0] }
  0xbe   :  { %1792 = vmatpush.bf16.msrb.mxu2 %v3277_v6  ;;  %1805 = vmatpush.bf16.msrb.mxu3 %v3405_v7  ;;  %v4243_v6 = vld [vmem:[#allocation5 + $0x8c] sm:$0xf]  ;;  %v3054_v7 = vld [vmem:[#allocation5 + $0x98] sm:$0xf0]  ;;  %v3489_v57 = vor.u32 %v4351_v44, %v3486_v45 }
  0xbf   :  { %v3057_v18 = vor.u32 %v4243_v6, %v3054_v7  ;;  %v3134_v53 = vld [vmem:[#allocation5 + $0x138] sm:$0xf0]  ;;  %v4227_v0 = vld [vmem:[#allocation5 + $0xc] sm:$0xf] }
  0xc0   :  { %1767 = vmatpush.bf16.msrb.mxu0 %v3005_v58  ;;  %1780 = vmatpush.bf16.msrb.mxu1 %v3133_v59  ;;  %v4279_v58 = vld [vmem:[#allocation5 + $0x1ac] sm:$0xf]  ;;  %v3198_v59 = vld [vmem:[#allocation5 + $0x1b8] sm:$0xf0]  ;;  %v3137_v63 = vor.u32 %v4263_v52, %v3134_v53 }
  0xc1   :  { %v3201_v5 = vor.u32 %v4279_v58, %v3198_v59  ;;  %v4315_v58 = vld [vmem:[#allocation5 + $0x2cc] sm:$0xf]  ;;  %v3342_v59 = vld [vmem:[#allocation5 + $0x2d8] sm:$0xf0] }
  0xc2   :  { %1793 = vmatpush.bf16.msrb.mxu2 %v3261_v21  ;;  %1806 = vmatpush.bf16.msrb.mxu3 %v3389_v14  ;;  %v4271_v21 = vld [vmem:[#allocation5 + $0x16c] sm:$0xf]  ;;  %v3166_v14 = vld [vmem:[#allocation5 + $0x178] sm:$0xf0] }
  0xc3   :  { %v3169_v31 = vor.u32 %v4271_v21, %v3166_v14  ;;  %v2990_v2 = vld [vmem:[#allocation5 + $0x18] sm:$0xf0]  ;;  %v4383_v6 = vld [vmem:[#allocation5 + $0x4ec] sm:$0xf] }
  0xc4   :  { %1768 = vmatpush.bf16.msrb.mxu0 %v2989_v12  ;;  %1781 = vmatpush.bf16.msrb.mxu1 %v3117_v13  ;;  %v3532_v12 = vld [vmem:[#allocation5 + $0x448] sm:$0xf]  ;;  %v4365_v13 = vld [vmem:[#allocation5 + $0x454] sm:$0xf0]  ;;  %v3614_v7 = vld [vmem:[#allocation5 + $0x4f8] sm:$0xf0] }
  0xc5   :  { %v3533_v22 = vor.u32 %v4365_v13, %v3532_v12  ;;  %v4415_v8 = vld [vmem:[#allocation5 + $0x5ec] sm:$0xf]  ;;  %v3742_v9 = vld [vmem:[#allocation5 + $0x5f8] sm:$0xf0]  ;;  %v3617_v15 = vor.u32 %v4383_v6, %v3614_v7 }
  0xc6   :  { %1794 = vmatpush.bf16.msrb.mxu2 %v3245_v37  ;;  %1807 = vmatpush.bf16.msrb.mxu3 %v3373_v41  ;;  %v3500_v37 = vld [vmem:[#allocation5 + $0x408] sm:$0xf]  ;;  %v4357_v41 = vld [vmem:[#allocation5 + $0x414] sm:$0xf0]  ;;  %v4311_v12 = vld [vmem:[#allocation5 + $0x2ac] sm:$0xf]  ;;  %v3745_v20 = vor.u32 %v4415_v8, %v3742_v9 }
  0xc7   :  { %1769 = vmatmul.bf16.vlgmr.msrb.gmra.mxu0 %v4810_v3  ;;  %1782 = vmatmul.bf16.vlgmr.msrb.gmra.mxu1 %v4812_v1  ;;  %v3326_v13 = vld [vmem:[#allocation5 + $0x2b8] sm:$0xf0]  ;;  %v4379_v21 = vld [vmem:[#allocation5 + $0x4cc] sm:$0xf] }
  0xc8   :  { %1813 = vmatpush.bf16.msra.mxu0 %v3613_v16  ;;  %1826 = vmatpush.bf16.msra.mxu1 %v3741_v17  ;;  %v3660_v16 = vld [vmem:[#allocation5 + $0x548] sm:$0xf]  ;;  %v4397_v17 = vld [vmem:[#allocation5 + $0x554] sm:$0xf0]  ;;  %v3598_v14 = vld [vmem:[#allocation5 + $0x4d8] sm:$0xf0]  ;;  %v3329_v26 = vor.u32 %v4311_v12, %v3326_v13 }
  0xc9   :  { %1795 = vmatmul.bf16.vlgmr.msrb.gmra.mxu2 %v4816_v23  ;;  %1808 = vmatmul.bf16.vlgmr.msrb.gmra.mxu3 %v4818_v24  ;;  %v3661_v25 = vor.u32 %v4397_v17, %v3660_v16  ;;  %v4343_v16 = vld [vmem:[#allocation5 + $0x3ac] sm:$0xf]  ;;  %v3454_v17 = vld [vmem:[#allocation5 + $0x3b8] sm:$0xf0] }
  0xca   :  { %1839 = vmatpush.bf16.msra.mxu2 %v3105_v38  ;;  %1852 = vmatpush.bf16.msra.mxu3 %v3233_v39  ;;  %v3628_v38 = vld [vmem:[#allocation5 + $0x508] sm:$0xf]  ;;  %v4389_v39 = vld [vmem:[#allocation5 + $0x514] sm:$0xf0]  ;;  %v3457_v27 = vor.u32 %v4343_v16, %v3454_v17  ;;  %v4307_v28 = vld [vmem:[#allocation5 + $0x28c] sm:$0xf] }
  0xcb   :  { %v3310_v29 = vld [vmem:[#allocation5 + $0x298] sm:$0xf0]  ;;  %v4335_v42 = vld [vmem:[#allocation5 + $0x36c] sm:$0xf] }
  0xcc   :  { %1814 = vmatpush.bf16.msra.mxu0 %v3597_v32  ;;  %1827 = vmatpush.bf16.msra.mxu1 %v3725_v33  ;;  %v4235_v32 = vld [vmem:[#allocation5 + $0x4c] sm:$0xf]  ;;  %v3022_v33 = vld [vmem:[#allocation5 + $0x58] sm:$0xf0] }
  0xcd   :  { %v3422_v43 = vld [vmem:[#allocation5 + $0x378] sm:$0xf0]  ;;  %v4403_v50 = vld [vmem:[#allocation5 + $0x58c] sm:$0xf] }
  0xce   :  { %1840 = vmatpush.bf16.msra.mxu2 %v3089_v54  ;;  %1853 = vmatpush.bf16.msra.mxu3 %v3217_v55  ;;  %v3501_v54 = vor.u32 %v4357_v41, %v3500_v37  ;;  %v3629_v55 = vor.u32 %v4389_v39, %v3628_v38  ;;  %v3313_v37 = vor.u32 %v4307_v28, %v3310_v29  ;;  %v4303_v38 = vld [vmem:[#allocation5 + $0x26c] sm:$0xf]  ;;  %v3294_v39 = vld [vmem:[#allocation5 + $0x278] sm:$0xf0] }
  0xcf   :  { %v3694_v51 = vld [vmem:[#allocation5 + $0x598] sm:$0xf0]  ;;  %v3297_v52 = vor.u32 %v4303_v38, %v3294_v39  ;;  %v3425_v53 = vor.u32 %v4335_v42, %v3422_v43  ;;  %v4363_v8 = vld [vmem:[#allocation5 + $0x44c] sm:$0xf] }
  0xd0   :  { %1815 = vmatpush.bf16.msra.mxu0 %v3581_v48  ;;  %1828 = vmatpush.bf16.msra.mxu1 %v3709_v49  ;;  %v3025_v48 = vor.u32 %v4235_v32, %v3022_v33  ;;  %v3153_v49 = vor.u32 %v4267_v34, %v3150_v35  ;;  %v3601_v32 = vor.u32 %v4379_v21, %v3598_v14  ;;  %v4375_v34 = vld [vmem:[#allocation5 + $0x4ac] sm:$0xf]  ;;  %v3582_v35 = vld [vmem:[#allocation5 + $0x4b8] sm:$0xf0]  ;;  %v4464_v14 = vld [vmem:[#allocation8 + $0x170] sm:$0xf0] }
  0xd1   :  { %v3585_v44 = vor.u32 %v4375_v34, %v3582_v35  ;;  %v3534_v9 = vld [vmem:[#allocation5 + $0x458] sm:$0xf0]  ;;  %v4291_v16 = vld [vmem:[#allocation5 + $0x20c] sm:$0xf]  ;;  %v3820_v34 = vld [vmem:[#allocation8 + $0x90] sm:$0xf] }
  0xd2   :  { %1841 = vmatpush.bf16.msra.mxu2 %v3073_v4  ;;  %1854 = vmatpush.bf16.msra.mxu3 %v3201_v5  ;;  %v4259_v4 = vld [vmem:[#allocation5 + $0x10c] sm:$0xf]  ;;  %v3118_v5 = vld [vmem:[#allocation5 + $0x118] sm:$0xf0]  ;;  %v4437_v35 = vld [vmem:[#allocation8 + $0x98] sm:$0xf0] }
  0xd3   :  { %v3246_v17 = vld [vmem:[#allocation5 + $0x218] sm:$0xf0]  ;;  %v3928_v21 = vld [vmem:[#allocation8 + $0x168] sm:$0xf] }
  0xd4   :  { %1816 = vmatpush.bf16.msra.mxu0 %v3565_v60  ;;  %1829 = vmatpush.bf16.msra.mxu1 %v3693_v61  ;;  %v4347_v60 = vld [vmem:[#allocation5 + $0x3cc] sm:$0xf]  ;;  %v3470_v61 = vld [vmem:[#allocation5 + $0x3d8] sm:$0xf0] }
  0xd5   :  { %v4391_v28 = vld [vmem:[#allocation5 + $0x52c] sm:$0xf]  ;;  %v3646_v29 = vld [vmem:[#allocation5 + $0x538] sm:$0xf0] }
  0xd6   :  { %1842 = vmatpush.bf16.msra.mxu2 %v3057_v18  ;;  %1855 = vmatpush.bf16.msra.mxu3 %v3185_v19  ;;  %v2993_v18 = vor.u32 %v4227_v0, %v2990_v2  ;;  %v3121_v19 = vor.u32 %v4259_v4, %v3118_v5  ;;  %v4295_v0 = vld [vmem:[#allocation5 + $0x22c] sm:$0xf]  ;;  %v3262_v2 = vld [vmem:[#allocation5 + $0x238] sm:$0xf0] }
  0xd7   :  { %v4327_v4 = vld [vmem:[#allocation5 + $0x32c] sm:$0xf]  ;;  %v3390_v5 = vld [vmem:[#allocation5 + $0x338] sm:$0xf0]  ;;  %v3265_v12 = vor.u32 %v4295_v0, %v3262_v2  ;;  %v4452_v0 = vld [vmem:[#allocation8 + $0x110] sm:$0xf0] }
  0xd8   :  { %1817 = vmatpush.bf16.msra.mxu0 %v3549_v10  ;;  %1830 = vmatpush.bf16.msra.mxu1 %v3677_v11  ;;  %v3345_v10 = vor.u32 %v4315_v58, %v3342_v59  ;;  %v3473_v11 = vor.u32 %v4347_v60, %v3470_v61  ;;  %v4367_v58 = vld [vmem:[#allocation5 + $0x46c] sm:$0xf]  ;;  %v3550_v59 = vld [vmem:[#allocation5 + $0x478] sm:$0xf0]  ;;  %v3393_v13 = vor.u32 %v4327_v4, %v3390_v5 }
  0xd9   :  { %v4399_v60 = vld [vmem:[#allocation5 + $0x56c] sm:$0xf]  ;;  %v3678_v61 = vld [vmem:[#allocation5 + $0x578] sm:$0xf0]  ;;  %v3553_v6 = vor.u32 %v4367_v58, %v3550_v59  ;;  %v4844_v58 = vld [vmem:[#allocation7] sm:$0xf] }
  0xda   :  { %1843 = vmatpush.bf16.msra.mxu2 %v3041_v30  ;;  %1856 = vmatpush.bf16.msra.mxu3 %v3169_v31  ;;  %v4339_v30 = vld [vmem:[#allocation5 + $0x38c] sm:$0xf]  ;;  %v3438_v31 = vld [vmem:[#allocation5 + $0x398] sm:$0xf0]  ;;  %v3681_v7 = vor.u32 %v4399_v60, %v3678_v61  ;;  %v637_v2 = vperm.slane %v4844_v58, 0 }
  0xdb   :  { %v3441_v41 = vor.u32 %v4339_v30, %v3438_v31  ;;  %v3249_v30 = vor.u32 %v4291_v16, %v3246_v17  ;;  %v4355_v38 = vld [vmem:[#allocation5 + $0x40c] sm:$0xf]  ;;  %v3502_v39 = vld [vmem:[#allocation5 + $0x418] sm:$0xf0]  ;;  %v4422_v16 = vld [vmem:[#allocation8 + $0x20] sm:$0xf0] }
  0xdc   :  { %1818 = vmatpush.bf16.msra.mxu0 %v3533_v22  ;;  %1831 = vmatpush.bf16.msra.mxu1 %v3661_v25  ;;  %v4411_v22 = vld [vmem:[#allocation5 + $0x5cc] sm:$0xf]  ;;  %v3726_v25 = vld [vmem:[#allocation5 + $0x5d8] sm:$0xf0] }
  0xdd   :  { %v3729_v33 = vor.u32 %v4411_v22, %v3726_v25  ;;  %v3537_v22 = vor.u32 %v4363_v8, %v3534_v9  ;;  %v4387_v42 = vld [vmem:[#allocation5 + $0x50c] sm:$0xf]  ;;  %v3630_v43 = vld [vmem:[#allocation5 + $0x518] sm:$0xf0]  ;;  %v3868_v8 = vld [vmem:[#allocation8 + $0xf0] sm:$0xf] }
  0xde   :  { %1844 = vmatpush.bf16.msra.mxu2 %v3025_v48  ;;  %1857 = vmatpush.bf16.msra.mxu3 %v3153_v49  ;;  %v4371_v48 = vld [vmem:[#allocation5 + $0x48c] sm:$0xf]  ;;  %v3566_v49 = vld [vmem:[#allocation5 + $0x498] sm:$0xf0]  ;;  %v4449_v9 = vld [vmem:[#allocation8 + $0xf8] sm:$0xf0] }
  0xdf   :  { %v3856_v17 = vld [vmem:[#allocation8 + $0xd8] sm:$0xf] }
  0xe0   :  { %1819 = vmatpush.bf16.msra.mxu0 %v3517_v36  ;;  %1832 = vmatpush.bf16.msra.mxu1 %v3645_v40  ;;  %v4407_v36 = vld [vmem:[#allocation5 + $0x5ac] sm:$0xf]  ;;  %v3710_v40 = vld [vmem:[#allocation5 + $0x5b8] sm:$0xf0] }
  0xe1   :  { %v3713_v45 = vor.u32 %v4407_v36, %v3710_v40  ;;  %v3916_v36 = vld [vmem:[#allocation8 + $0x150] sm:$0xf]  ;;  %v4461_v40 = vld [vmem:[#allocation8 + $0x158] sm:$0xf0] }
  0xe2   :  { %1845 = vmatpush.bf16.msra.mxu2 %v3009_v62  ;;  %1858 = vmatpush.bf16.msra.mxu3 %v3137_v63 }
  0xe4   :  { %1820 = vmatpush.bf16.msra.mxu0 %v3501_v54  ;;  %1833 = vmatpush.bf16.msra.mxu1 %v3629_v55  ;;  %v4299_v54 = vld [vmem:[#allocation5 + $0x24c] sm:$0xf]  ;;  %v3278_v55 = vld [vmem:[#allocation5 + $0x258] sm:$0xf0] }
  0xe5   :  { %v3281_v62 = vor.u32 %v4299_v54, %v3278_v55 }
  0xe6   :  { %1846 = vmatpush.bf16.msra.mxu2 %v2993_v18  ;;  %1859 = vmatpush.bf16.msra.mxu3 %v3121_v19  ;;  %v4323_v18 = vld [vmem:[#allocation5 + $0x30c] sm:$0xf]  ;;  %v3374_v19 = vld [vmem:[#allocation5 + $0x318] sm:$0xf0] }
  0xe7   :  { %1821 = vmatmul.bf16.vlgmr.msra.gmra.mxu0 %v4822_v46  ;;  %1834 = vmatmul.bf16.vlgmr.msra.gmra.mxu1 %v4824_v47  ;;  %v3377_v31 = vor.u32 %v4323_v18, %v3374_v19  ;;  %v4446_v18 = vld [vmem:[#allocation8 + $0xe0] sm:$0xf0] }
  0xe8   :  { %1865 = vmatpush.bf16.msrb.mxu0 %v3361_v56  ;;  %1878 = vmatpush.bf16.msrb.mxu1 %v3489_v57  ;;  %v3406_v56 = vld [vmem:[#allocation5 + $0x358] sm:$0xf0]  ;;  %v3697_v57 = vor.u32 %v4403_v50, %v3694_v51  ;;  %v4458_v51 = vld [vmem:[#allocation8 + $0x140] sm:$0xf0] }
  0xe9   :  { %1847 = vmatmul.bf16.vlgmr.msra.gmra.mxu2 %v4810_v3  ;;  %1860 = vmatmul.bf16.vlgmr.msra.gmra.mxu3 %v4812_v1  ;;  %v4331_v3 = vld [vmem:[#allocation5 + $0x34c] sm:$0xf]  ;;  %v3569_v1 = vor.u32 %v4371_v48, %v3566_v49  ;;  %v3808_v48 = vld [vmem:[#allocation8 + $0x78] sm:$0xf]  ;;  %v4434_v49 = vld [vmem:[#allocation8 + $0x80] sm:$0xf0] }
  0xea   :  { %1891 = vmatpush.bf16.msrb.mxu2 %v3617_v15  ;;  %1904 = vmatpush.bf16.msrb.mxu3 %v3745_v20  ;;  %v3409_v63 = vor.u32 %v4331_v3, %v3406_v56  ;;  %v3832_v15 = vld [vmem:[#allocation8 + $0xa8] sm:$0xf]  ;;  %v4440_v20 = vld [vmem:[#allocation8 + $0xb0] sm:$0xf0]  ;;  %v3904_v50 = vld [vmem:[#allocation8 + $0x138] sm:$0xf]  ;;  %v3809_v54 = vor.u32 %v4434_v49, %v3808_v48 }
  0xeb   :  { %v3905_v55 = vor.u32 %v4458_v51, %v3904_v50  ;;  %v3796_v3 = vld [vmem:[#allocation8 + $0x60] sm:$0xf]  ;;  %v4431_v56 = vld [vmem:[#allocation8 + $0x68] sm:$0xf0]  ;;  %v4012_v50 = vld [vmem:[#allocation8 + $0x210] sm:$0xf] }
  0xec   :  { %1866 = vmatpush.bf16.msrb.mxu0 %v3345_v10  ;;  %1879 = vmatpush.bf16.msrb.mxu1 %v3473_v11  ;;  %v4395_v10 = vld [vmem:[#allocation5 + $0x54c] sm:$0xf]  ;;  %v3662_v11 = vld [vmem:[#allocation5 + $0x558] sm:$0xf0]  ;;  %v3797_v61 = vor.u32 %v4431_v56, %v3796_v3  ;;  %v3918_v49 = vld [vmem:[#allocation8 + $0x15c] sm:$0xf0] }
  0xed   :  { %v3665_v25 = vor.u32 %v4395_v10, %v3662_v11  ;;  %v4485_v51 = vld [vmem:[#allocation8 + $0x218] sm:$0xf0] }
  0xee   :  { %1892 = vmatpush.bf16.msrb.mxu2 %v3601_v32  ;;  %1905 = vmatpush.bf16.msrb.mxu3 %v3729_v33  ;;  %v3833_v32 = vor.u32 %v4440_v20, %v3832_v15  ;;  %v3929_v33 = vor.u32 %v4464_v14, %v3928_v21  ;;  %v3748_v15 = vld [vmem:[#allocation8] sm:$0xf]  ;;  %v3857_v21 = vor.u32 %v4446_v18, %v3856_v17  ;;  %v4419_v14 = vld [vmem:[#allocation8 + $0x8] sm:$0xf0] }
  0xf0   :  { %1867 = vmatpush.bf16.msrb.mxu0 %v3329_v26  ;;  %1880 = vmatpush.bf16.msrb.mxu1 %v3457_v27  ;;  %v4359_v26 = vld [vmem:[#allocation5 + $0x42c] sm:$0xf]  ;;  %v3518_v27 = vld [vmem:[#allocation5 + $0x438] sm:$0xf0] }
  0xf2   :  { %1893 = vmatpush.bf16.msrb.mxu2 %v3585_v44  ;;  %1906 = vmatpush.bf16.msrb.mxu3 %v3713_v45  ;;  %v3821_v44 = vor.u32 %v4437_v35, %v3820_v34  ;;  %v3917_v45 = vor.u32 %v4461_v40, %v3916_v36  ;;  %v4488_v34 = vld [vmem:[#allocation8 + $0x230] sm:$0xf0] }
  0xf4   :  { %1868 = vmatpush.bf16.msrb.mxu0 %v3313_v37  ;;  %1881 = vmatpush.bf16.msrb.mxu1 %v3441_v41  ;;  %v3521_v37 = vor.u32 %v4359_v26, %v3518_v27  ;;  %v3649_v41 = vor.u32 %v4391_v28, %v3646_v29  ;;  %v4439_v28 = vld [vmem:[#allocation8 + $0xac] sm:$0xf]  ;;  %v3834_v29 = vld [vmem:[#allocation8 + $0xb4] sm:$0xf0] }
  0xf6   :  { %1894 = vmatpush.bf16.msrb.mxu2 %v3569_v1  ;;  %1907 = vmatpush.bf16.msrb.mxu3 %v3697_v57  ;;  %v3892_v1 = vld [vmem:[#allocation8 + $0x120] sm:$0xf]  ;;  %v4455_v57 = vld [vmem:[#allocation8 + $0x128] sm:$0xf0] }
  0xf8   :  { %1869 = vmatpush.bf16.msrb.mxu0 %v3297_v52  ;;  %1882 = vmatpush.bf16.msrb.mxu1 %v3425_v53  ;;  %v3505_v52 = vor.u32 %v4355_v38, %v3502_v39  ;;  %v3633_v53 = vor.u32 %v4387_v42, %v3630_v43  ;;  %v3837_v39 = vor.u32 %v4439_v28, %v3834_v29  ;;  %v4436_v43 = vld [vmem:[#allocation8 + $0x94] sm:$0xf] }
  0xfa   :  { %1895 = vmatpush.bf16.msrb.mxu2 %v3553_v6  ;;  %1908 = vmatpush.bf16.msrb.mxu3 %v3681_v7  ;;  %v3772_v6 = vld [vmem:[#allocation8 + $0x30] sm:$0xf]  ;;  %v4425_v7 = vld [vmem:[#allocation8 + $0x38] sm:$0xf0] }
  0xfc   :  { %1870 = vmatpush.bf16.msrb.mxu0 %v3281_v62  ;;  %1883 = vmatpush.bf16.msrb.mxu1 %v3409_v63  ;;  %v3784_v62 = vld [vmem:[#allocation8 + $0x48] sm:$0xf] }
  0xfd   :  { %v3880_v63 = vld [vmem:[#allocation8 + $0x108] sm:$0xf] }
  0xfe   :  { %1896 = vmatpush.bf16.msrb.mxu2 %v3537_v22  ;;  %1909 = vmatpush.bf16.msrb.mxu3 %v3665_v25  ;;  %v3881_v5 = vor.u32 %v4452_v0, %v3880_v63  ;;  %v3844_v22 = vld [vmem:[#allocation8 + $0xc0] sm:$0xf]  ;;  %v4443_v25 = vld [vmem:[#allocation8 + $0xc8] sm:$0xf0]  ;;  %v4482_v63 = vld [vmem:[#allocation8 + $0x200] sm:$0xf0] }
  0xff   :  { %v3845_v38 = vor.u32 %v4443_v25, %v3844_v22  ;;  %v3882_v22 = vld [vmem:[#allocation8 + $0x114] sm:$0xf0] }
 0x100   :  { %1871 = vmatpush.bf16.msrb.mxu0 %v3265_v12  ;;  %1884 = vmatpush.bf16.msrb.mxu1 %v3393_v13  ;;  %v3760_v13 = vld [vmem:[#allocation8 + $0x18] sm:$0xf] }
 0x101   :  { %v3761_v20 = vor.u32 %v4422_v16, %v3760_v13  ;;  %v4476_v13 = vld [vmem:[#allocation8 + $0x1d0] sm:$0xf0] }
 0x102   :  { %1897 = vmatpush.bf16.msrb.mxu2 %v3521_v37  ;;  %1910 = vmatpush.bf16.msrb.mxu3 %v3649_v41  ;;  %v3749_v41 = vor.u32 %v4419_v14, %v3748_v15  ;;  %v4427_v15 = vld [vmem:[#allocation8 + $0x4c] sm:$0xf] }
 0x103   :  { %v4451_v14 = vld [vmem:[#allocation8 + $0x10c] sm:$0xf] }
 0x104   :  { %1872 = vmatpush.bf16.msrb.mxu0 %v3249_v30  ;;  %1885 = vmatpush.bf16.msrb.mxu1 %v3377_v31  ;;  %v1614_v59 = vpop.f32.mrf.mxu0  ;;  %v1627_v60 = vpop.f32.mrf.mxu1  ;;  %v4463_v30 = vld [vmem:[#allocation8 + $0x16c] sm:$0xf] }
 0x105   :  { %v1615_v10 = vadd.f32 %v1614_v59, %v637_v2  ;;  %v4457_v59 = vld [vmem:[#allocation8 + $0x13c] sm:$0xf] }
 0x106   :  { %1898 = vmatpush.bf16.msrb.mxu2 %v3505_v52  ;;  %1911 = vmatpush.bf16.msrb.mxu3 %v3633_v53  ;;  %v4013_v52 = vor.u32 %v4485_v51, %v4012_v50  ;;  %v4470_v50 = vld [vmem:[#allocation8 + $0x1a0] sm:$0xf0] }
 0x107   :  { %1873 = vmatmul.bf16.vlgmr.msrb.gmra.mxu0 %v4816_v23  ;;  %1886 = vmatmul.bf16.vlgmr.msrb.gmra.mxu1 %v4818_v24  ;;  %v3893_v23 = vor.u32 %v4455_v57, %v3892_v1  ;;  %v4428_v24 = vld [vmem:[#allocation8 + $0x50] sm:$0xf0]  ;;  %v1628_v19 = vadd.f32 %v1627_v60, %v1615_v10  ;;  %v4433_v1 = vld [vmem:[#allocation8 + $0x7c] sm:$0xf]  ;;  %v3810_v57 = vld [vmem:[#allocation8 + $0x84] sm:$0xf0] }
 0x108   :  { %2573 = vmatpush.bf16.msra.mxu0 %v3833_v32  ;;  %2586 = vmatpush.bf16.msra.mxu1 %v3929_v33  ;;  %v3785_v4 = vor.u32 %v4428_v24, %v3784_v62  ;;  %v3930_v32 = vld [vmem:[#allocation8 + $0x174] sm:$0xf0]  ;;  %v4024_v33 = vld [vmem:[#allocation8 + $0x228] sm:$0xf]  ;;  %v3798_v10 = vld [vmem:[#allocation8 + $0x6c] sm:$0xf0] }
 0x109   :  { %1899 = vmatmul.bf16.vlgmr.msrb.gmra.mxu2 %v4822_v46  ;;  %1912 = vmatmul.bf16.vlgmr.msrb.gmra.mxu3 %v4824_v47  ;;  %v3773_v46 = vor.u32 %v4425_v7, %v3772_v6  ;;  %v3869_v47 = vor.u32 %v4449_v9, %v3868_v8  ;;  %v4025_v40 = vor.u32 %v4488_v34, %v4024_v33  ;;  %v4430_v8 = vld [vmem:[#allocation8 + $0x64] sm:$0xf]  ;;  %v4479_v9 = vld [vmem:[#allocation8 + $0x1e8] sm:$0xf0]  ;;  %v3774_v34 = vld [vmem:[#allocation8 + $0x3c] sm:$0xf0] }
 0x10a   :  { %v3933_v42 = vor.u32 %v4463_v30, %v3930_v32  ;;  %v3813_v6 = vor.u32 %v4433_v1, %v3810_v57  ;;  %v3801_v18 = vor.u32 %v4430_v8, %v3798_v10  ;;  %v4424_v32 = vld [vmem:[#allocation8 + $0x34] sm:$0xf] }
 0x10b   :  { %2599 = vmatpush.bf16.msra.mxu2 %v4025_v40 }
 0x10c   :  { %2574 = vmatpush.bf16.msra.mxu0 %v3821_v44  ;;  %2587 = vmatpush.bf16.msra.mxu1 %v3917_v45  ;;  %v1616_v11 = vpop.f32.mrf.mxu0  ;;  %v1629_v12 = vpop.f32.mrf.mxu1  ;;  %v3822_v44 = vld [vmem:[#allocation8 + $0x9c] sm:$0xf0]  ;;  %v4460_v45 = vld [vmem:[#allocation8 + $0x154] sm:$0xf] }
 0x10d   :  { %v1640_v26 = vpop.f32.mrf.mxu2  ;;  %v1653_v27 = vpop.f32.mrf.mxu3  ;;  %v3825_v3 = vor.u32 %v4436_v43, %v3822_v44  ;;  %v3921_v56 = vor.u32 %v4460_v45, %v3918_v49  ;;  %v4454_v11 = vld [vmem:[#allocation8 + $0x124] sm:$0xf]  ;;  %v3894_v12 = vld [vmem:[#allocation8 + $0x12c] sm:$0xf0]  ;;  %v3762_v43 = vld [vmem:[#allocation8 + $0x24] sm:$0xf0] }
 0x10e   :  { %v1641_v31 = vadd.f32 %v1640_v26, %v1628_v19  ;;  %v3897_v19 = vor.u32 %v4454_v11, %v3894_v12  ;;  %v3964_v26 = vld [vmem:[#allocation8 + $0x1b0] sm:$0xf]  ;;  %v4445_v44 = vld [vmem:[#allocation8 + $0xdc] sm:$0xf]  ;;  %v3952_v49 = vld [vmem:[#allocation8 + $0x198] sm:$0xf] }
 0x10f   :  { %2600 = vmatpush.bf16.msra.mxu2 %v4013_v52  ;;  %v3953_v51 = vor.u32 %v4470_v50, %v3952_v49  ;;  %v3940_v52 = vld [vmem:[#allocation8 + $0x180] sm:$0xf]  ;;  %v3828_v11 = vld [vmem:[#allocation8 + $0x98] sm:$0xf]  ;;  %v4438_v12 = vld [vmem:[#allocation8 + $0xa0] sm:$0xf0] }
 0x110   :  { %2575 = vmatpush.bf16.msra.mxu0 %v3809_v54  ;;  %2588 = vmatpush.bf16.msra.mxu1 %v3905_v55  ;;  %v1654_v37 = vadd.f32 %v1653_v27, %v1641_v31  ;;  %v4473_v27 = vld [vmem:[#allocation8 + $0x1b8] sm:$0xf0]  ;;  %v3885_v31 = vor.u32 %v4451_v14, %v3882_v22  ;;  %v3829_v14 = vor.u32 %v4438_v12, %v3828_v11  ;;  %v3816_v22 = vld [vmem:[#allocation8 + $0x80] sm:$0xf]  ;;  %v4506_v49 = vld [vmem:[#allocation8 + $0x2c0] sm:$0xf0] }
 0x111   :  { %v3965_v40 = vor.u32 %v4473_v27, %v3964_v26  ;;  %v4481_v27 = vld [vmem:[#allocation8 + $0x1fc] sm:$0xf]  ;;  %v4459_v50 = vld [vmem:[#allocation8 + $0x148] sm:$0xf0]  ;;  %v4072_v11 = vld [vmem:[#allocation8 + $0x288] sm:$0xf] }
 0x112   :  { %v4500_v12 = vld [vmem:[#allocation8 + $0x290] sm:$0xf0] }
 0x114   :  { %2576 = vmatpush.bf16.msra.mxu0 %v3797_v61  ;;  %2589 = vmatpush.bf16.msra.mxu1 %v3893_v23  ;;  %v1666_v35 = vpop.f32.mrf.mxu0  ;;  %v1679_v36 = vpop.f32.mrf.mxu1  ;;  %v3906_v61 = vld [vmem:[#allocation8 + $0x144] sm:$0xf0]  ;;  %v4000_v23 = vld [vmem:[#allocation8 + $0x1f8] sm:$0xf] }
 0x115   :  { %v1667_v48 = vadd.f32 %v1666_v35, %v1654_v37  ;;  %v1642_v54 = vpop.f32.mrf.mxu2  ;;  %v1655_v55 = vpop.f32.mrf.mxu3  ;;  %v4001_v2 = vor.u32 %v4482_v63, %v4000_v23  ;;  %v3909_v7 = vor.u32 %v4457_v59, %v3906_v61  ;;  %v4448_v35 = vld [vmem:[#allocation8 + $0xf4] sm:$0xf]  ;;  %v3846_v61 = vld [vmem:[#allocation8 + $0xcc] sm:$0xf0]  ;;  %v4487_v63 = vld [vmem:[#allocation8 + $0x22c] sm:$0xf] }
 0x116   :  { %v3840_v23 = vld [vmem:[#allocation8 + $0xb0] sm:$0xf] }
 0x117   :  { %v1680_v53 = vadd.f32 %v1679_v36, %v1667_v48  ;;  %2601 = vmatpush.bf16.msra.mxu2 %v4001_v2  ;;  %v3870_v36 = vld [vmem:[#allocation8 + $0xfc] sm:$0xf0]  ;;  %v3858_v48 = vld [vmem:[#allocation8 + $0xe4] sm:$0xf0]  ;;  %v4026_v2 = vld [vmem:[#allocation8 + $0x234] sm:$0xf0] }
 0x118   :  { %2577 = vmatpush.bf16.msra.mxu0 %v3785_v4  ;;  %2590 = vmatpush.bf16.msra.mxu1 %v3881_v5  ;;  %v3988_v4 = vld [vmem:[#allocation8 + $0x1e0] sm:$0xf]  ;;  %v638_v5 = vperm.slane %v4844_v58, 1  ;;  %v3861_v55 = vor.u32 %v4445_v44, %v3858_v48  ;;  %v3804_v44 = vld [vmem:[#allocation8 + $0x68] sm:$0xf] }
 0x119   :  { %v1917_v60 = vmax.f32 %v1680_v53, 0.0  ;;  %v4467_v53 = vld [vmem:[#allocation8 + $0x188] sm:$0xf0] }
 0x11b   :  { %v4849_v0 = vpack.c.bf16 %v1917_v60, %v1917_v60  ;;  %v4442_v60 = vld [vmem:[#allocation8 + $0xc4] sm:$0xf] }
 0x11c   :  { %2578 = vmatpush.bf16.msra.mxu0 %v3773_v46  ;;  %2591 = vmatpush.bf16.msra.mxu1 %v3869_v47  ;;  %v1668_v62 = vpop.f32.mrf.mxu0  ;;  %v1681_v24 = vpop.f32.mrf.mxu1  ;;  %v3989_v46 = vor.u32 %v4479_v9, %v3988_v4  ;;  %v3976_v47 = vld [vmem:[#allocation8 + $0x1c8] sm:$0xf]  ;;  %v4029_v4 = vor.u32 %v4487_v63, %v4026_v2  ;;  %v3849_v8 = vor.u32 %v4442_v60, %v3846_v61  ;;  %v4456_v61 = vld [vmem:[#allocation8 + $0x130] sm:$0xf0] }
 0x11d   :  { %v1692_v16 = vpop.f32.mrf.mxu2  ;;  %v1705_v17 = vpop.f32.mrf.mxu3  ;;  %v3977_v25 = vor.u32 %v4476_v13, %v3976_v47  ;;  %v3941_v62 = vor.u32 %v4467_v53, %v3940_v52  ;;  %v4441_v24 = vld [vmem:[#allocation8 + $0xb8] sm:$0xf0]  ;;  %v4014_v47 = vld [vmem:[#allocation8 + $0x21c] sm:$0xf0]  ;;  %v4120_v13 = vld [vmem:[#allocation8 + $0x2e8] sm:$0xf] }
 0x11e   :  { %2602 = vmatpush.bf16.msra.mxu2 %v3989_v46  ;;  %v3841_v10 = vor.u32 %v4441_v24, %v3840_v23  ;;  %v4484_v46 = vld [vmem:[#allocation8 + $0x214] sm:$0xf]  ;;  %v4475_v52 = vld [vmem:[#allocation8 + $0x1cc] sm:$0xf]  ;;  %v3978_v53 = vld [vmem:[#allocation8 + $0x1d4] sm:$0xf0] }
 0x11f   :  { %v3981_v60 = vor.u32 %v4475_v52, %v3978_v53  ;;  %v3966_v24 = vld [vmem:[#allocation8 + $0x1bc] sm:$0xf0]  ;;  %v3852_v53 = vld [vmem:[#allocation8 + $0xc8] sm:$0xf] }
 0x120   :  { %2579 = vmatpush.bf16.msra.mxu0 %v3761_v20  ;;  %2592 = vmatpush.bf16.msra.mxu1 %v3857_v21  ;;  %v1693_v20 = vadd.f32 %v1692_v16, %v638_v5  ;;  %v3786_v21 = vld [vmem:[#allocation8 + $0x54] sm:$0xf0] }
 0x121   :  { %v3789_v30 = vor.u32 %v4427_v15, %v3786_v21  ;;  %v4512_v15 = vld [vmem:[#allocation8 + $0x2f0] sm:$0xf0] }
 0x122   :  { %v1706_v33 = vadd.f32 %v1705_v17, %v1693_v20  ;;  %2603 = vmatpush.bf16.msra.mxu2 %v3977_v25  ;;  %v3936_v17 = vld [vmem:[#allocation8 + $0x170] sm:$0xf]  ;;  %v4121_v20 = vor.u32 %v4512_v15, %v4120_v13  ;;  %v4435_v25 = vld [vmem:[#allocation8 + $0x88] sm:$0xf0]  ;;  %v4073_v13 = vor.u32 %v4500_v12, %v4072_v11  ;;  %v3768_v15 = vld [vmem:[#allocation8 + $0x20] sm:$0xf] }
 0x123   :  { %v4074_v11 = vld [vmem:[#allocation8 + $0x294] sm:$0xf0] }
 0x124   :  { %2580 = vmatpush.bf16.msra.mxu0 %v3749_v41  ;;  %2593 = vmatpush.bf16.msra.mxu1 %v3845_v38  ;;  %v1718_v28 = vpop.f32.mrf.mxu0  ;;  %v1731_v29 = vpop.f32.mrf.mxu1  ;;  %v3777_v38 = vor.u32 %v4424_v32, %v3774_v34  ;;  %v4462_v32 = vld [vmem:[#allocation8 + $0x160] sm:$0xf0]  ;;  %v4509_v34 = vld [vmem:[#allocation8 + $0x2d8] sm:$0xf0] }
 0x125   :  { %v1694_v37 = vpop.f32.mrf.mxu2  ;;  %v1707_v41 = vpop.f32.mrf.mxu3  ;;  %v1719_v45 = vadd.f32 %v1718_v28, %v1706_v33  ;;  %2612 = vmatpush.bf16.msra.mxu3 %v4121_v20  ;;  %v4002_v28 = vld [vmem:[#allocation8 + $0x204] sm:$0xf0]  ;;  %v4423_v20 = vld [vmem:[#allocation8 + $0x28] sm:$0xf0] }
 0x126   :  { %2604 = vmatpush.bf16.msra.mxu2 %v3965_v40  ;;  %v4005_v33 = vor.u32 %v4481_v27, %v4002_v28  ;;  %v3817_v37 = vor.u32 %v4435_v25, %v3816_v22  ;;  %v3912_v41 = vld [vmem:[#allocation8 + $0x140] sm:$0xf]  ;;  %v4450_v22 = vld [vmem:[#allocation8 + $0x100] sm:$0xf0]  ;;  %v3942_v27 = vld [vmem:[#allocation8 + $0x18c] sm:$0xf0] }
 0x127   :  { %2581 = vmatmul.bf16.vlgmr.msra.gmra.mxu0 %v4849_v0  ;;  %v1732_v59 = vadd.f32 %v1731_v29, %v1719_v45  ;;  %v4108_v29 = vld [vmem:[#allocation8 + $0x2d0] sm:$0xf]  ;;  %v4432_v45 = vld [vmem:[#allocation8 + $0x70] sm:$0xf0]  ;;  %v639_v28 = vperm.slane %v4844_v58, 2 }
 0x128   :  { %2625 = vmatpush.bf16.msrb.mxu0 %v3837_v39  ;;  %2638 = vmatpush.bf16.msrb.mxu1 %v3933_v42  ;;  %v3873_v39 = vor.u32 %v4448_v35, %v3870_v36  ;;  %v4421_v42 = vld [vmem:[#allocation8 + $0x1c] sm:$0xf]  ;;  %v4109_v40 = vor.u32 %v4509_v34, %v4108_v29  ;;  %v3769_v29 = vor.u32 %v4423_v20, %v3768_v15  ;;  %v3864_v34 = vld [vmem:[#allocation8 + $0xe0] sm:$0xf]  ;;  %v4496_v15 = vld [vmem:[#allocation8 + $0x274] sm:$0xf] }
 0x129   :  { %v3765_v54 = vor.u32 %v4421_v42, %v3762_v43  ;;  %v4096_v42 = vld [vmem:[#allocation8 + $0x2b8] sm:$0xf]  ;;  %v4062_v20 = vld [vmem:[#allocation8 + $0x27c] sm:$0xf0] }
 0x12a   :  { %2605 = vmatpush.bf16.msra.mxu2 %v3953_v51  ;;  %2613 = vmatpush.bf16.msra.mxu3 %v4109_v40  ;;  %v4097_v51 = vor.u32 %v4506_v49, %v4096_v42  ;;  %v4491_v49 = vld [vmem:[#allocation8 + $0x248] sm:$0xf0] }
 0x12c   :  { %2626 = vmatpush.bf16.msrb.mxu0 %v3825_v3  ;;  %2639 = vmatpush.bf16.msrb.mxu1 %v3921_v56  ;;  %v4418_v3 = vld [vmem:[#allocation8 + $0x4] sm:$0xf]  ;;  %v3750_v56 = vld [vmem:[#allocation8 + $0xc] sm:$0xf0]  ;;  %v1720_v1 = vpop.f32.mrf.mxu0  ;;  %v1733_v57 = vpop.f32.mrf.mxu1 }
 0x12d   :  { %v1744_v5 = vpop.f32.mrf.mxu2  ;;  %v3900_v1 = vld [vmem:[#allocation8 + $0x128] sm:$0xf]  ;;  %v3792_v57 = vld [vmem:[#allocation8 + $0x50] sm:$0xf] }
 0x12e   :  { %v1745_v9 = vadd.f32 %v1744_v5, %v1732_v59  ;;  %2606 = vmatpush.bf16.msra.mxu2 %v3941_v62  ;;  %v4429_v59 = vld [vmem:[#allocation8 + $0x58] sm:$0xf0]  ;;  %2614 = vmatpush.bf16.msra.mxu3 %v4097_v51  ;;  %v4472_v62 = vld [vmem:[#allocation8 + $0x1b4] sm:$0xf]  ;;  %v3901_v5 = vor.u32 %v4456_v61, %v3900_v1  ;;  %v4122_v51 = vld [vmem:[#allocation8 + $0x2f4] sm:$0xf0] }
 0x12f   :  { %v3793_v63 = vor.u32 %v4429_v59, %v3792_v57  ;;  %v4508_v1 = vld [vmem:[#allocation8 + $0x2d4] sm:$0xf]  ;;  %v4110_v57 = vld [vmem:[#allocation8 + $0x2dc] sm:$0xf0] }
 0x130   :  { %2627 = vmatpush.bf16.msrb.mxu0 %v3813_v6  ;;  %2640 = vmatpush.bf16.msrb.mxu1 %v3909_v7  ;;  %v1757_v6 = vpop.f32.mrf.mxu3  ;;  %v3753_v7 = vor.u32 %v4418_v3, %v3750_v56  ;;  %v3805_v3 = vor.u32 %v4432_v45, %v3804_v44  ;;  %v3913_v56 = vor.u32 %v4459_v50, %v3912_v41  ;;  %v4048_v41 = vld [vmem:[#allocation8 + $0x258] sm:$0xf]  ;;  %v4036_v45 = vld [vmem:[#allocation8 + $0x240] sm:$0xf]  ;;  %v4511_v50 = vld [vmem:[#allocation8 + $0x2ec] sm:$0xf] }
 0x131   :  { %v1758_v16 = vadd.f32 %v1757_v6, %v1745_v9  ;;  %v3780_v6 = vld [vmem:[#allocation8 + $0x38] sm:$0xf]  ;;  %v3888_v9 = vld [vmem:[#allocation8 + $0x110] sm:$0xf] }
 0x132   :  { %2651 = vmatpush.bf16.msrb.mxu2 %v4029_v4 }
 0x133   :  { %v1918_v21 = vmax.f32 %v1758_v16, 0.0  ;;  %v4469_v16 = vld [vmem:[#allocation8 + $0x19c] sm:$0xf] }
 0x134   :  { %2628 = vmatpush.bf16.msrb.mxu0 %v3801_v18  ;;  %2641 = vmatpush.bf16.msrb.mxu1 %v3897_v19  ;;  %v4465_v18 = vld [vmem:[#allocation8 + $0x178] sm:$0xf0]  ;;  %v4017_v19 = vor.u32 %v4484_v46, %v4014_v47  ;;  %v3876_v47 = vld [vmem:[#allocation8 + $0xf8] sm:$0xf] }
 0x135   :  { %v3937_v26 = vor.u32 %v4465_v18, %v3936_v17  ;;  %v1746_v35 = vpop.f32.mrf.mxu2  ;;  %v3954_v17 = vld [vmem:[#allocation8 + $0x1a4] sm:$0xf0]  ;;  %v4060_v18 = vld [vmem:[#allocation8 + $0x270] sm:$0xf] }
 0x136   :  { %2652 = vmatpush.bf16.msrb.mxu2 %v4017_v19  ;;  %v3756_v35 = vld [vmem:[#allocation8 + $0x8] sm:$0xf] }
 0x138   :  { %2629 = vmatpush.bf16.msrb.mxu0 %v3789_v30  ;;  %2642 = vmatpush.bf16.msrb.mxu1 %v3885_v31  ;;  %v4853_v30 = vpack.c.bf16 %v1918_v21, %v1918_v21  ;;  %v3924_v31 = vld [vmem:[#allocation8 + $0x158] sm:$0xf]  ;;  %v1759_v36 = vpop.f32.mrf.mxu3  ;;  %v3957_v21 = vor.u32 %v4469_v16, %v3954_v17 }
 0x139   :  { %v3925_v43 = vor.u32 %v4462_v32, %v3924_v31  ;;  %v4420_v36 = vld [vmem:[#allocation8 + $0x10] sm:$0xf0] }
 0x13a   :  { %2594 = vmatmul.bf16.vlgmr.msra.gmra.mxu1 %v4853_v30  ;;  %2653 = vmatpush.bf16.msrb.mxu2 %v4005_v33  ;;  %v3877_v33 = vor.u32 %v4450_v22, %v3876_v47  ;;  %v3757_v42 = vor.u32 %v4420_v36, %v3756_v35  ;;  %v4032_v47 = vld [vmem:[#allocation8 + $0x230] sm:$0xf]  ;;  %v4065_v22 = vor.u32 %v4496_v15, %v4062_v20  ;;  %v3996_v35 = vld [vmem:[#allocation8 + $0x1e8] sm:$0xf]  ;;  %v4480_v36 = vld [vmem:[#allocation8 + $0x1f0] sm:$0xf0] }
 0x13b   :  { %v4080_v15 = vld [vmem:[#allocation8 + $0x290] sm:$0xf]  ;;  %v4501_v20 = vld [vmem:[#allocation8 + $0x298] sm:$0xf0] }
 0x13c   :  { %2630 = vmatpush.bf16.msrb.mxu0 %v3777_v38  ;;  %2643 = vmatpush.bf16.msrb.mxu1 %v3873_v39  ;;  %v4478_v38 = vld [vmem:[#allocation8 + $0x1e4] sm:$0xf]  ;;  %v3990_v39 = vld [vmem:[#allocation8 + $0x1ec] sm:$0xf0] }
 0x13d   :  { %v3993_v48 = vor.u32 %v4478_v38, %v3990_v39  ;;  %v4494_v38 = vld [vmem:[#allocation8 + $0x260] sm:$0xf0] }
 0x13e   :  { %v4049_v39 = vor.u32 %v4494_v38, %v4048_v41  ;;  %v3997_v38 = vor.u32 %v4480_v36, %v3996_v35 }
 0x13f   :  { %2654 = vmatpush.bf16.msrb.mxu2 %v3993_v48 }
 0x140   :  { %2631 = vmatpush.bf16.msrb.mxu0 %v3765_v54  ;;  %2644 = vmatpush.bf16.msrb.mxu1 %v3861_v55  ;;  %v4084_v54 = vld [vmem:[#allocation8 + $0x2a0] sm:$0xf]  ;;  %v4503_v55 = vld [vmem:[#allocation8 + $0x2a8] sm:$0xf0] }
 0x141   :  { %v4085_v23 = vor.u32 %v4503_v55, %v4084_v54  ;;  %v4444_v54 = vld [vmem:[#allocation8 + $0xd0] sm:$0xf0]  ;;  %v4037_v55 = vor.u32 %v4491_v49, %v4036_v45  ;;  %v4474_v49 = vld [vmem:[#allocation8 + $0x1c0] sm:$0xf0] }
 0x143   :  { %2655 = vmatpush.bf16.msrb.mxu2 %v3981_v60  ;;  %2615 = vmatpush.bf16.msra.mxu3 %v4085_v23  ;;  %v4113_v60 = vor.u32 %v4508_v1, %v4110_v57  ;;  %v3948_v1 = vld [vmem:[#allocation8 + $0x188] sm:$0xf]  ;;  %v4468_v57 = vld [vmem:[#allocation8 + $0x190] sm:$0xf0] }
 0x144   :  { %2632 = vmatpush.bf16.msrb.mxu0 %v3753_v7  ;;  %2645 = vmatpush.bf16.msrb.mxu1 %v3849_v8  ;;  %v1770_v2 = vpop.f32.mrf.mxu0  ;;  %v4857_v4 = vpop.f32.mrf.mxu1  ;;  %v4426_v7 = vld [vmem:[#allocation8 + $0x40] sm:$0xf0]  ;;  %v3969_v8 = vor.u32 %v4472_v62, %v3966_v24  ;;  %v4505_v62 = vld [vmem:[#allocation8 + $0x2bc] sm:$0xf]  ;;  %v4098_v24 = vld [vmem:[#allocation8 + $0x2c4] sm:$0xf0] }
 0x145   :  { %v3781_v46 = vor.u32 %v4426_v7, %v3780_v6  ;;  %v1771_v52 = vadd.f32 %v1770_v2, %v639_v28  ;;  %v4101_v2 = vor.u32 %v4505_v62, %v4098_v24  ;;  %v4086_v6 = vld [vmem:[#allocation8 + $0x2ac] sm:$0xf0]  ;;  %v4493_v28 = vld [vmem:[#allocation8 + $0x25c] sm:$0xf] }
 0x147   :  { %2633 = vmatmul.bf16.vlgmr.msrb.gmra.mxu0 %v4849_v0  ;;  %2656 = vmatpush.bf16.msrb.mxu2 %v3969_v8  ;;  %v1784_v59 = vadd.f32 %v4857_v4, %v1771_v52  ;;  %v3960_v52 = vld [vmem:[#allocation8 + $0x1a0] sm:$0xf] }
 0x148   :  { %2677 = vmatpush.bf16.msra.mxu0 %v3841_v10  ;;  %2690 = vmatpush.bf16.msra.mxu1 %v3937_v26  ;;  %v4453_v10 = vld [vmem:[#allocation8 + $0x118] sm:$0xf0]  ;;  %v4466_v26 = vld [vmem:[#allocation8 + $0x184] sm:$0xf] }
 0x149   :  { %v3889_v19 = vor.u32 %v4453_v10, %v3888_v9  ;;  %2616 = vmatpush.bf16.msra.mxu3 %v4073_v13  ;;  %v3945_v40 = vor.u32 %v4466_v26, %v3942_v27  ;;  %v4489_v13 = vld [vmem:[#allocation8 + $0x238] sm:$0xf0]  ;;  %v4008_v26 = vld [vmem:[#allocation8 + $0x200] sm:$0xf]  ;;  %v4483_v27 = vld [vmem:[#allocation8 + $0x208] sm:$0xf0] }
 0x14a   :  { %2646 = vmatmul.bf16.vlgmr.msrb.gmra.mxu1 %v4853_v30  ;;  %v4033_v17 = vor.u32 %v4489_v13, %v4032_v47  ;;  %v4104_v47 = vld [vmem:[#allocation8 + $0x2c0] sm:$0xf]  ;;  %v4507_v13 = vld [vmem:[#allocation8 + $0x2c8] sm:$0xf0] }
 0x14b   :  { %2657 = vmatpush.bf16.msrb.mxu2 %v3957_v21 }
 0x14c   :  { %2678 = vmatpush.bf16.msra.mxu0 %v3829_v14  ;;  %2691 = vmatpush.bf16.msra.mxu1 %v3925_v43  ;;  %v4497_v14 = vld [vmem:[#allocation8 + $0x278] sm:$0xf0]  ;;  %v1772_v31 = vpop.f32.mrf.mxu0  ;;  %v1785_v32 = vpop.f32.mrf.mxu1 }
 0x14d   :  { %v4061_v25 = vor.u32 %v4497_v14, %v4060_v18  ;;  %v1796_v43 = vpop.f32.mrf.mxu2  ;;  %v1809_v44 = vpop.f32.mrf.mxu3  ;;  %v4020_v18 = vld [vmem:[#allocation8 + $0x218] sm:$0xf] }
 0x14f   :  { %2617 = vmatpush.bf16.msra.mxu3 %v4061_v25  ;;  %2658 = vmatpush.bf16.msrb.mxu2 %v3945_v40  ;;  %v4490_v40 = vld [vmem:[#allocation8 + $0x244] sm:$0xf] }
 0x150   :  { %2679 = vmatpush.bf16.msra.mxu0 %v3817_v37  ;;  %2692 = vmatpush.bf16.msra.mxu1 %v3913_v56  ;;  %v4447_v37 = vld [vmem:[#allocation8 + $0xe8] sm:$0xf0]  ;;  %v3853_v56 = vor.u32 %v4444_v54, %v3852_v53 }
 0x151   :  { %v3865_v48 = vor.u32 %v4447_v37, %v3864_v34  ;;  %v4009_v34 = vor.u32 %v4483_v27, %v4008_v26  ;;  %v4038_v37 = vld [vmem:[#allocation8 + $0x24c] sm:$0xf0]  ;;  %v4471_v53 = vld [vmem:[#allocation8 + $0x1a8] sm:$0xf0]  ;;  %v4056_v27 = vld [vmem:[#allocation8 + $0x260] sm:$0xf] }
 0x152   :  { %v4041_v41 = vor.u32 %v4490_v40, %v4038_v37 }
 0x153   :  { %2618 = vmatpush.bf16.msra.mxu3 %v4049_v39  ;;  %v3984_v39 = vld [vmem:[#allocation8 + $0x1d0] sm:$0xf] }
 0x154   :  { %2680 = vmatpush.bf16.msra.mxu0 %v3805_v3  ;;  %2693 = vmatpush.bf16.msra.mxu1 %v3901_v5  ;;  %v4125_v3 = vor.u32 %v4511_v50, %v4122_v51  ;;  %v4502_v5 = vld [vmem:[#allocation8 + $0x2a4] sm:$0xf]  ;;  %v640_v50 = vperm.slane %v4844_v58, 3 }
 0x155   :  { %v1798_v61 = vpop.f32.mrf.mxu2  ;;  %v1811_v23 = vpop.f32.mrf.mxu3  ;;  %v4089_v4 = vor.u32 %v4502_v5, %v4086_v6  ;;  %v4128_v6 = vld [vmem:[#allocation8 + $0x2f0] sm:$0xf] }
 0x157   :  { %2619 = vmatpush.bf16.msra.mxu3 %v4037_v55 }
 0x158   :  { %2681 = vmatpush.bf16.msra.mxu0 %v3793_v63  ;;  %2694 = vmatpush.bf16.msra.mxu1 %v3889_v19  ;;  %v1797_v63 = vadd.f32 %v1796_v43, %v1784_v59  ;;  %v4486_v19 = vld [vmem:[#allocation8 + $0x220] sm:$0xf0] }
 0x159   :  { %v4021_v25 = vor.u32 %v4486_v19, %v4020_v18  ;;  %v4504_v18 = vld [vmem:[#allocation8 + $0x2b0] sm:$0xf0] }
 0x15a   :  { %v1810_v7 = vadd.f32 %v1809_v44, %v1797_v63 }
 0x15b   :  { %2664 = vmatpush.bf16.msrb.mxu3 %v4125_v3 }
 0x15c   :  { %2682 = vmatpush.bf16.msra.mxu0 %v3781_v46  ;;  %2695 = vmatpush.bf16.msra.mxu1 %v3877_v33 }
 0x15f   :  { %2665 = vmatpush.bf16.msrb.mxu3 %v4113_v60  ;;  %v3949_v60 = vor.u32 %v4468_v57, %v3948_v1  ;;  %v4518_v1 = vld [vmem:[#allocation10 + $0x20] sm:$0xff] }
 0x160   :  { %2683 = vmatpush.bf16.msra.mxu0 %v3769_v29  ;;  %2696 = vmatpush.bf16.msra.mxu1 %v3865_v48  ;;  %v4050_v29 = vld [vmem:[#allocation8 + $0x264] sm:$0xf0]  ;;  %v3972_v48 = vld [vmem:[#allocation8 + $0x1b8] sm:$0xf] }
 0x161   :  { %v4053_v33 = vor.u32 %v4493_v28, %v4050_v29  ;;  %v3973_v51 = vor.u32 %v4474_v49, %v3972_v48  ;;  %v4495_v28 = vld [vmem:[#allocation8 + $0x268] sm:$0xf0] }
 0x162   :  { %v4057_v29 = vor.u32 %v4495_v28, %v4056_v27 }
 0x163   :  { %2666 = vmatpush.bf16.msrb.mxu3 %v4101_v2 }
 0x164   :  { %2684 = vmatpush.bf16.msra.mxu0 %v3757_v42  ;;  %2697 = vmatpush.bf16.msra.mxu1 %v3853_v56  ;;  %v1822_v8 = vpop.f32.mrf.mxu0  ;;  %v1835_v9 = vpop.f32.mrf.mxu1  ;;  %v4477_v42 = vld [vmem:[#allocation8 + $0x1d8] sm:$0xf0]  ;;  %v3961_v56 = vor.u32 %v4471_v53, %v3960_v52  ;;  %v4520_v53 = vld [vmem:[#allocation10 + $0x30] sm:$0xff] }
 0x165   :  { %v1823_v10 = vadd.f32 %v1822_v8, %v1810_v7  ;;  %v3985_v45 = vor.u32 %v4477_v42, %v3984_v39  ;;  %v4513_v7 = vld [vmem:[#allocation8 + $0x2f8] sm:$0xf0] }
 0x166   :  { %v4129_v8 = vor.u32 %v4513_v7, %v4128_v6  ;;  %v4525_v6 = vld [vmem:[#allocation10 + $0x58] sm:$0xff] }
 0x167   :  { %2685 = vmatmul.bf16.vlgmr.msra.gmra.mxu0 %v4849_v0  ;;  %2698 = vmatmul.bf16.vlgmr.msra.gmra.mxu1 %v4853_v30  ;;  %v4499_v0 = vld [vmem:[#allocation8 + $0x28c] sm:$0xf]  ;;  %v1836_v46 = vadd.f32 %v1835_v9, %v1823_v10  ;;  %v4510_v10 = vld [vmem:[#allocation8 + $0x2e0] sm:$0xf0]  ;;  %v4537_v7 = vld [vmem:[#allocation10 + $0xb8] sm:$0xff] }
 0x168   :  { %2667 = vmatpush.bf16.msrb.mxu3 %v4089_v4  ;;  %v4077_v12 = vor.u32 %v4499_v0, %v4074_v11  ;;  %v4116_v0 = vld [vmem:[#allocation8 + $0x2d8] sm:$0xf] }
 0x169   :  { %v1919_v16 = vmax.f32 %v1836_v46, 0.0  ;;  %v4117_v46 = vor.u32 %v4510_v10, %v4116_v0  ;;  %v4523_v0 = vld [vmem:[#allocation10 + $0x48] sm:$0xff] }
 0x16a   :  { %v4535_v10 = vld [vmem:[#allocation10 + $0xa8] sm:$0xff] }
 0x16b   :  { %v1923_v30 = vpack.c.bf16 %v1919_v16, %v1919_v16  ;;  %v4105_v16 = vor.u32 %v4507_v13, %v4104_v47  ;;  %v4533_v47 = vld [vmem:[#allocation10 + $0x98] sm:$0xff] }
 0x16c   :  { %2668 = vmatpush.bf16.msrb.mxu3 %v4077_v12  ;;  %v1824_v21 = vpop.f32.mrf.mxu0  ;;  %v1837_v14 = vpop.f32.mrf.mxu1 }
 0x16d   :  { %2607 = vmatmul.bf16.vlgmr.msra.gmra.mxu2 %v1923_v30  ;;  %v1848_v31 = vpop.f32.mrf.mxu2  ;;  %v1861_v32 = vpop.f32.mrf.mxu3  ;;  %v4081_v21 = vor.u32 %v4501_v20, %v4080_v15  ;;  %v4068_v14 = vld [vmem:[#allocation8 + $0x278] sm:$0xf]  ;;  %v4530_v20 = vld [vmem:[#allocation10 + $0x80] sm:$0xff] }
 0x16e   :  { %2703 = vmatpush.bf16.msra.mxu2 %v4033_v17  ;;  %v1849_v3 = vadd.f32 %v1848_v31, %v640_v50  ;;  %v4092_v17 = vld [vmem:[#allocation8 + $0x2a8] sm:$0xf] }
 0x16f   :  { %v4044_v31 = vld [vmem:[#allocation8 + $0x248] sm:$0xf] }
 0x170   :  { %2669 = vmatpush.bf16.msrb.mxu3 %v4065_v22  ;;  %v1862_v59 = vadd.f32 %v1861_v32, %v1849_v3  ;;  %v4498_v22 = vld [vmem:[#allocation8 + $0x280] sm:$0xf0]  ;;  %v4492_v32 = vld [vmem:[#allocation8 + $0x250] sm:$0xf0] }
 0x172   :  { %2704 = vmatpush.bf16.msra.mxu2 %v4021_v25  ;;  %v4069_v25 = vor.u32 %v4498_v22, %v4068_v14 }
 0x174   :  { %2670 = vmatpush.bf16.msrb.mxu3 %v4053_v33  ;;  %v4045_v33 = vor.u32 %v4492_v32, %v4044_v31 }
 0x175   :  { %v1850_v43 = vpop.f32.mrf.mxu2  ;;  %v1863_v44 = vpop.f32.mrf.mxu3 }
 0x176   :  { %2705 = vmatpush.bf16.msra.mxu2 %v4009_v34  ;;  %v2053_v34 = vld [vmem:[%s4887_s4] sm:$0x7] }
 0x177   :  { %v2055_v35 = vperm.slane %v2053_v34, 0  ;;  %v2056_v42 = vperm.slane %v2053_v34, 1  ;;  %v2057_v49 = vperm.slane %v2053_v34, 2 }
 0x178   :  { %2671 = vmatpush.bf16.msrb.mxu3 %v4041_v41 }
 0x17a   :  { %2706 = vmatpush.bf16.msra.mxu2 %v3997_v38 }
 0x17d   :  { %2659 = vmatmul.bf16.vlgmr.msrb.gmra.mxu2 %v1923_v30 }
 0x17e   :  { %2707 = vmatpush.bf16.msra.mxu2 %v3985_v45 }
 0x182   :  { %2708 = vmatpush.bf16.msra.mxu2 %v3973_v51  ;;  %v4521_v51 = vld [vmem:[#allocation10 + $0x38] sm:$0xff] }
 0x183   :  { %2931 = vmatpush.bf16.msrb.mxu0 %v4521_v51 }
 0x184   :  { %v1874_v54 = vpop.f32.mrf.mxu0  ;;  %v1887_v55 = vpop.f32.mrf.mxu1 }
 0x185   :  { %v1875_v61 = vadd.f32 %v1874_v54, %v1862_v59  ;;  %v4517_v59 = vld [vmem:[#allocation10 + $0x18] sm:$0xff] }
 0x186   :  { %2709 = vmatpush.bf16.msra.mxu2 %v3961_v56  ;;  %v4519_v56 = vld [vmem:[#allocation10 + $0x28] sm:$0xff] }
 0x187   :  { %v1888_v24 = vadd.f32 %v1887_v55, %v1875_v61  ;;  %2932 = vmatpush.bf16.msrb.mxu0 %v4520_v53  ;;  %v4528_v61 = vld [vmem:[#allocation10 + $0x70] sm:$0xff] }
 0x18a   :  { %2710 = vmatpush.bf16.msra.mxu2 %v3949_v60  ;;  %v4529_v60 = vld [vmem:[#allocation10 + $0x78] sm:$0xff] }
 0x18b   :  { %2933 = vmatpush.bf16.msrb.mxu0 %v4519_v56  ;;  %2944 = vmatpush.bf16.msrb.mxu1 %v4529_v60 }
 0x18c   :  { %v1876_v23 = vpop.f32.mrf.mxu0  ;;  %v1889_v62 = vpop.f32.mrf.mxu1 }
 0x18d   :  { %v1900_v58 = vpop.f32.mrf.mxu2  ;;  %v1913_v63 = vpop.f32.mrf.mxu3  ;;  %2711 = vmatmul.bf16.vlgmr.msra.gmra.mxu2 %v1923_v30  ;;  %v4093_v30 = vor.u32 %v4504_v18, %v4092_v17  ;;  %v4516_v23 = vld [vmem:[#allocation10 + $0x10] sm:$0xff]  ;;  %v4531_v17 = vld [vmem:[#allocation10 + $0x88] sm:$0xff] }
 0x18e   :  { %v1901_v2 = vadd.f32 %v1900_v58, %v1888_v24  ;;  %v4515_v24 = vld [vmem:[#allocation10 + $0x8] sm:$0xff]  ;;  %2957 = vmatpush.bf16.msrb.mxu2 %v4537_v7 }
 0x18f   :  { %2934 = vmatpush.bf16.msrb.mxu0 %v4518_v1  ;;  %2945 = vmatpush.bf16.msrb.mxu1 %v4528_v61  ;;  %v4527_v58 = vld [vmem:[#allocation10 + $0x68] sm:$0xff] }
 0x190   :  { %v1914_v5 = vadd.f32 %v1913_v63, %v1901_v2  ;;  %v4514_v2 = vld [vmem:[#allocation10] sm:$0xff] }
 0x192   :  { %v1920_v4 = vmax.f32 %v1914_v5, 0.0  ;;  %v4526_v5 = vld [vmem:[#allocation10 + $0x60] sm:$0xff] }
 0x193   :  { %2935 = vmatpush.bf16.msrb.mxu0 %v4517_v59  ;;  %2946 = vmatpush.bf16.msrb.mxu1 %v4527_v58 }
 0x194   :  { %v1924_v9 = vpack.c.bf16 %v1920_v4, %v1920_v4 }
 0x195   :  { %v1902_v11 = vpop.f32.mrf.mxu2  ;;  %v1915_v12 = vpop.f32.mrf.mxu3 }
 0x196   :  { %2620 = vmatmul.bf16.vlgmr.msra.gmra.mxu3 %v1924_v9  ;;  %v4522_v12 = vld [vmem:[#allocation10 + $0x40] sm:$0xff] }
 0x197   :  { %2716 = vmatpush.bf16.msra.mxu3 %v4129_v8  ;;  %2936 = vmatpush.bf16.msrb.mxu0 %v4516_v23  ;;  %v4524_v8 = vld [vmem:[#allocation10 + $0x50] sm:$0xff] }
 0x198   :  { %2947 = vmatpush.bf16.msrb.mxu1 %v4526_v5 }
 0x19b   :  { %2717 = vmatpush.bf16.msra.mxu3 %v4117_v46  ;;  %2937 = vmatpush.bf16.msrb.mxu0 %v4515_v24  ;;  %v4534_v46 = vld [vmem:[#allocation10 + $0xa0] sm:$0xff] }
 0x19c   :  { %2948 = vmatpush.bf16.msrb.mxu1 %v4525_v6 }
 0x19f   :  { %2718 = vmatpush.bf16.msra.mxu3 %v4105_v16  ;;  %2938 = vmatpush.bf16.msrb.mxu0 %v4514_v2  ;;  %v4532_v16 = vld [vmem:[#allocation10 + $0x90] sm:$0xff] }
 0x1a0   :  { %2949 = vmatpush.bf16.msrb.mxu1 %v4524_v8 }
 0x1a3   :  { %2719 = vmatpush.bf16.msra.mxu3 %v4093_v30 }
 0x1a4   :  { %v2582_v19 = vpop.f32.mrf.mxu0  ;;  %2950 = vmatpush.bf16.msrb.mxu1 %v4523_v0 }
 0x1a5   :  { %v2583_v40 = vadd.f32 %v2582_v19, %v2055_v35 }
 0x1a6   :  { %2672 = vmatmul.bf16.vlgmr.msrb.gmra.mxu3 %v1924_v9 }
 0x1a7   :  { %2720 = vmatpush.bf16.msra.mxu3 %v4081_v21 }
 0x1a8   :  { %2951 = vmatpush.bf16.msrb.mxu1 %v4522_v12 }
 0x1ab   :  { %2721 = vmatpush.bf16.msra.mxu3 %v4069_v25 }
 0x1ac   :  { %v2584_v26 = vpop.f32.mrf.mxu0 }
 0x1af   :  { %2722 = vmatpush.bf16.msra.mxu3 %v4057_v29 }
 0x1b3   :  { %2723 = vmatpush.bf16.msra.mxu3 %v4045_v33 }
 0x1b6   :  { %2724 = vmatmul.bf16.vlgmr.msra.gmra.mxu3 %v1924_v9  ;;  %v4536_v9 = vld [vmem:[#allocation10 + $0xb0] sm:$0xff] }
 0x1b7   :  { %v2595_v37 = vpop.f32.mrf.mxu1  ;;  %2958 = vmatpush.bf16.msrb.mxu2 %v4536_v9 }
 0x1b8   :  { %v4868_v41 = vadd.f32 %v2595_v37, %v2583_v40 }
 0x1bb   :  { %2959 = vmatpush.bf16.msrb.mxu2 %v4535_v10 }
 0x1bf   :  { %v2597_v39 = vpop.f32.mrf.mxu1  ;;  %2960 = vmatpush.bf16.msrb.mxu2 %v4534_v46 }
 0x1c3   :  { %2961 = vmatpush.bf16.msrb.mxu2 %v4533_v47 }
 0x1c4   :  { %v2634_v36 = vpop.f32.mrf.mxu0 }
 0x1c5   :  { %v2635_v43 = vadd.f32 %v2634_v36, %v2056_v42  ;;  %v4549_v42 = vld [vmem:[%s4889_s6] ss:$0 sm:$0xff] }
 0x1c7   :  { %v2647_v44 = vpop.f32.mrf.mxu1  ;;  %2962 = vmatpush.bf16.msrb.mxu2 %v4532_v16 }
 0x1c8   :  { %v4870_v45 = vadd.f32 %v2647_v44, %v2635_v43 }
 0x1cb   :  { %2963 = vmatpush.bf16.msrb.mxu2 %v4531_v17 }
 0x1cc   :  { %v2636_v38 = vpop.f32.mrf.mxu0 }
 0x1cf   :  { %v2649_v48 = vpop.f32.mrf.mxu1  ;;  %2964 = vmatpush.bf16.msrb.mxu2 %v4530_v20 }
 0x1e4   :  { %v2686_v50 = vpop.f32.mrf.mxu0  ;;  %v2699_v54 = vpop.f32.mrf.mxu1 }
 0x1e5   :  { %v2687_v52 = vadd.f32 %v2686_v50, %v2057_v49 }
 0x1e7   :  { %v4872_v55 = vadd.f32 %v2699_v54, %v2687_v52 }
 0x1ec   :  { %v2688_v3 = vpop.f32.mrf.mxu0  ;;  %v2701_v57 = vpop.f32.mrf.mxu1 }
 0x1f0   :  { %v2608_v62 = vpop.f32.mrf.mxu2 }
 0x1f1   :  { %v2609_v18 = vadd.f32 %v2608_v62, %v4868_v41 }
 0x1f8   :  { %v2610_v63 = vpop.f32.mrf.mxu2 }
 0x200   :  { %v2660_v4 = vpop.f32.mrf.mxu2 }
 0x201   :  { %v2661_v25 = vadd.f32 %v2660_v4, %v4870_v45 }
 0x208   :  { %v2662_v11 = vpop.f32.mrf.mxu2 }
 0x210   :  { %v2712_v13 = vpop.f32.mrf.mxu2 }
 0x211   :  { %v2713_v32 = vadd.f32 %v2712_v13, %v4872_v55 }
 0x218   :  { %v2714_v30 = vpop.f32.mrf.mxu2 }
 0x219   :  { %v2621_v19 = vpop.f32.mrf.mxu3 }
 0x21a   :  { %v2622_v15 = vadd.f32 %v2621_v19, %v2609_v18 }
 0x21c   :  { %v2729_v21 = vmax.f32 %v2622_v15, 0.0 }
 0x21e   :  { %v2732_v14 = vpack.c.bf16 %v2729_v21, %v2729_v21 }
 0x220   :  { %2939 = vmatmul.bf16.vlgmr.msrb.gmra.mxu0 %v2732_v14 }
 0x221   :  { %v2623_v22 = vpop.f32.mrf.mxu3 }
 0x229   :  { %v2673_v26 = vpop.f32.mrf.mxu3 }
 0x22a   :  { %v2674_v27 = vadd.f32 %v2673_v26, %v2661_v25 }
 0x22c   :  { %v2730_v28 = vmax.f32 %v2674_v27, 0.0 }
 0x22e   :  { %v2733_v29 = vpack.c.bf16 %v2730_v28, %v2730_v28 }
 0x230   :  { %2952 = vmatmul.bf16.vlgmr.msrb.gmra.mxu1 %v2733_v29 }
 0x231   :  { %v2675_v31 = vpop.f32.mrf.mxu3 }
 0x239   :  { %v2725_v33 = vpop.f32.mrf.mxu3 }
 0x23a   :  { %v2726_v34 = vadd.f32 %v2725_v33, %v2713_v32 }
 0x23c   :  { %v2731_v35 = vmax.f32 %v2726_v34, 0.0 }
 0x23e   :  { %v2734_v36 = vpack.c.bf16 %v2731_v35, %v2731_v35 }
 0x240   :  { %2965 = vmatmul.bf16.vlgmr.msrb.gmra.mxu2 %v2734_v36 }
 0x241   :  { %v2727_v40 = vpop.f32.mrf.mxu3 }
 0x29d   :  { %v2940_v37 = vpop.f32.mrf.mxu0 }
 0x29e   :  { %v2941_v43 = vadd.f32 %v4549_v42, %v2940_v37 }
 0x2a5   :  { %v2942_v41 = vpop.f32.mrf.mxu0 }
 0x2ad   :  { %v2953_v38 = vpop.f32.mrf.mxu1 }
 0x2ae   :  { %v2954_v44 = vadd.f32 %v2953_v38, %v2941_v43 }
 0x2b5   :  { %v2955_v39 = vpop.f32.mrf.mxu1 }
 0x2c3   :  { %v2966_v45 = vpop.f32.mrf.mxu2 }
 0x2c4   :  { %v2967_v48 = vadd.f32 %v2966_v45, %v2954_v44 }
 0x2c6   :  { %2970 = vst [vmem:[%s4890_s7] sm:$0xf] %v2967_v48 }
 0x2cb   :  { %v2968_v49 = vpop.f32.mrf.mxu2 }
 0x2cc   :  { %2975 = vsyncpa [#allocation4], 1 }
 0x2cd   :  { %2976 = vsyncpa [#allocation6], 1 }
 0x2ce   :  { %2977 = vsyncpa [#allocation9], 1 }

</bundles_post_ra>
